<compile_context>
chip_gen: v7x
topology: tpu7x:2x2x1
jax: 0.10.0
libtpu: 0.0.40
codegen_flags: <defaults>
</compile_context>

<pallas_src>
import functools

import jax
import jax.numpy as jnp
from jax.experimental import pallas as pl
from jax.experimental.pallas import tpu as pltpu

HIDDEN = 768
FC1 = 512
FC2 = 256
NUM_CLASSES = 6
OUT_PAD = 128          # lane-dense padded width of the fc3 / log-softmax output
NEG_BIG = -1e30        # acts as -inf for the padded logits (exp underflows to 0)


def bert_arch_head_kernel(x_ref, w1_ref, b1_ref, w2_ref, b2_ref,
                          w3_ref, b3_ref, out_ref):
    """fc1 -> relu -> (dropout=id) -> fc2 -> relu -> (dropout=id) -> fc3 -> log_softmax.

    x_ref:  (tile_b, 768) bf16 activation tile
    w*_ref: bf16 weights (VMEM-resident across the whole grid)
    b*_ref: f32 biases; b3 pad columns hold -1e30
    out:    (tile_b, 128) f32, lane-dense; columns 6..127 are padded garbage.
    """
    x = x_ref[...]                                                 # (tb, 768) bf16

    # x = relu(fc1(x)); dropout(0.2) = identity at inference.
    h1 = jnp.dot(x, w1_ref[...], preferred_element_type=jnp.float32) + b1_ref[...]
    h1 = jnp.maximum(h1, 0.0).astype(jnp.bfloat16)                 # (tb, 512)

    # x = relu(fc2(x)); dropout(0.2) = identity at inference.
    h2 = jnp.dot(h1, w2_ref[...], preferred_element_type=jnp.float32) + b2_ref[...]
    h2 = jnp.maximum(h2, 0.0).astype(jnp.bfloat16)                 # (tb, 256)

    # x = fc3(x)   (padded to 128 lanes; pad bias = -1e30)
    logits = jnp.dot(h2, w3_ref[...], preferred_element_type=jnp.float32) + b3_ref[...]

    # LogSoftmax(dim=1).  Pad lanes contribute exp(-huge) == 0, so the
    # normalization equals the 6-class result exactly.
    m = jnp.max(logits, axis=-1, keepdims=True)
    shifted = logits - m
    lse = jnp.log(jnp.sum(jnp.exp(shifted), axis=-1, keepdims=True))
    out_ref[...] = (shifted - lse).astype(out_ref.dtype)


def _round_up(x, m):
    return ((x + m - 1) // m) * m


def bert_arch_head(cls_hs, params, *, tile_b=256):
    """Run the Pallas classification-head kernel on the CLS hidden states."""
    w1, b1, w2, b2, w3, b3 = params
    B = cls_hs.shape[0]
    assert tile_b % 16 == 0, "tile_b must be a multiple of 16 (bf16 sublane pack)"

    # bf16 datapath into the MXU; f32 accumulation inside the kernel.
    x = cls_hs.astype(jnp.bfloat16)
    w1b = w1.astype(jnp.bfloat16)
    w2b = w2.astype(jnp.bfloat16)
    b1r = jnp.reshape(b1, (1, FC1)).astype(jnp.float32)
    b2r = jnp.reshape(b2, (1, FC2)).astype(jnp.float32)

    # Lane-dense fc3: pad 6 -> 128 output columns.  Pad weights are 0 and pad
    # biases are -1e30 so the padded log_softmax matches the 6-class one.
    w3p = jnp.zeros((FC2, OUT_PAD), jnp.bfloat16)
    w3p = w3p.at[:, :NUM_CLASSES].set(w3.astype(jnp.bfloat16))
    b3p = jnp.full((1, OUT_PAD), NEG_BIG, jnp.float32)
    b3p = b3p.at[:, :NUM_CLASSES].set(jnp.reshape(b3, (1, NUM_CLASSES)))

    # Pad the batch so it tiles cleanly (>= 16 rows for bf16 sublane packing).
    tb = tile_b if B >= tile_b else max(_round_up(B, 16), 16)
    padded_B = _round_up(B, tb)
    if padded_B != B:
        x = jnp.pad(x, ((0, padded_B - B), (0, 0)))
    grid = (padded_B // tb,)

    const = lambda shape: pl.BlockSpec(shape, lambda i: (0, 0))

    out_padded = pl.pallas_call(
        bert_arch_head_kernel,
        out_shape=jax.ShapeDtypeStruct((padded_B, OUT_PAD), jnp.float32),
        grid_spec=pltpu.PrefetchScalarGridSpec(
            num_scalar_prefetch=0,
            grid=grid,
            in_specs=[
                pl.BlockSpec((tb, HIDDEN), lambda i: (i, 0)),   # activation tile
                const((HIDDEN, FC1)), const((1, FC1)),          # fc1 (resident)
                const((FC1, FC2)),    const((1, FC2)),          # fc2 (resident)
                const((FC2, OUT_PAD)), const((1, OUT_PAD)),     # fc3 (resident, padded)
            ],
            out_specs=pl.BlockSpec((tb, OUT_PAD), lambda i: (i, 0)),
        ),
        compiler_params=pltpu.CompilerParams(
            dimension_semantics=("parallel",)),   # v7x: split batch across 2 TCs
    )(x, w1b, b1r, w2b, b2r, w3p, b3p)

    return out_padded[:B, :NUM_CLASSES]


def head_reference(cls_hs, params):
    """Pure-JAX reference of the head with the same bf16 rounding points."""
    w1, b1, w2, b2, w3, b3 = params
    f = lambda a: a.astype(jnp.bfloat16).astype(jnp.float32)
    x = f(cls_hs)
    h1 = jnp.maximum(x @ f(w1) + jnp.reshape(b1, (1, -1)), 0.0)
    h2 = jnp.maximum(f(h1) @ f(w2) + jnp.reshape(b2, (1, -1)), 0.0)
    logits = f(h2) @ f(w3) + jnp.reshape(b3, (1, -1))
    return jax.nn.log_softmax(logits, axis=-1)


def init_params(key):
    """Deterministic synthetic parameters with the shapes from BERT_Arch.__init__."""
    k1, k2, k3, k4, k5, k6 = jax.random.split(key, 6)
    w1 = jax.random.normal(k1, (HIDDEN, FC1), jnp.float32) * (1.0 / jnp.sqrt(HIDDEN))
    b1 = jax.random.normal(k2, (1, FC1), jnp.float32) * 0.01
    w2 = jax.random.normal(k3, (FC1, FC2), jnp.float32) * (1.0 / jnp.sqrt(FC1))
    b2 = jax.random.normal(k4, (1, FC2), jnp.float32) * 0.01
    w3 = jax.random.normal(k5, (FC2, NUM_CLASSES), jnp.float32) * (1.0 / jnp.sqrt(FC2))
    b3 = jax.random.normal(k6, (1, NUM_CLASSES), jnp.float32) * 0.01
    return (w1, b1, w2, b2, w3, b3)


def bert_arch_forward(sent_id, mask, params, emb_table):
    """Full BERT_Arch.forward.

    # TODO(synk): the pretrained DistilBERT encoder (bert(sent_id, attention_mask=mask)[0][:, 0])
    # has no self-contained Pallas equivalent; the CLS hidden state is substituted by a
    # deterministic embedding lookup of the first token.
    """
    del mask  # attention mask only feeds the (substituted) backbone
    # TODO(synk): this gather could be fused into the kernel via scalar-prefetch +
    # manual per-row DMA once the real backbone output lives in HBM; kept in JAX
    # glue here since the backbone itself is already a stand-in.
    cls_hs = emb_table[sent_id[:, 0]]          # (B, 768) stand-in for CLS hidden state
    return bert_arch_head(cls_hs, params)


if __name__ == "__main__":
    key = jax.random.PRNGKey(0)
    k_params, k_emb, k_ids, k_ids2 = jax.random.split(key, 4)

    params = init_params(k_params)

    VOCAB = 100
    BATCH = 2
    SEQ = 8
    emb_table = jax.random.normal(k_emb, (VOCAB, HIDDEN), jnp.float32) * 0.02
    sent_id = jax.random.randint(k_ids, (BATCH, SEQ), 0, VOCAB, dtype=jnp.int32)
    mask = jnp.ones((BATCH, SEQ), dtype=jnp.int32)

    out = bert_arch_forward(sent_id, mask, params, emb_table)
    out = jax.block_until_ready(out)

    # sanity: shape + log-softmax rows sum (in prob space) to ~1
    assert out.shape == (BATCH, NUM_CLASSES)
    row_sums = jnp.sum(jnp.exp(out), axis=1)
    assert jnp.allclose(row_sums, jnp.ones((BATCH,)), atol=1e-3)

    # numeric check against a pure-JAX reference with matching bf16 rounding
    ref = head_reference(emb_table[sent_id[:, 0]], params)
    assert jnp.allclose(out, ref, atol=5e-3, rtol=5e-3)

    # exercise the multi-tile grid path (grid > 1, batch padding) with a small tile
    B2 = 40
    sent_id2 = jax.random.randint(k_ids2, (B2, SEQ), 0, VOCAB, dtype=jnp.int32)
    cls2 = emb_table[sent_id2[:, 0]]
    out2 = jax.block_until_ready(bert_arch_head(cls2, params, tile_b=16))
    assert out2.shape == (B2, NUM_CLASSES)
    assert jnp.allclose(jnp.sum(jnp.exp(out2), axis=1), jnp.ones((B2,)), atol=1e-3)
    assert jnp.allclose(out2, head_reference(cls2, params), atol=5e-3, rtol=5e-3)

    print("KERNEL_OK")
</pallas_src>

<mosaic_0001>
module attributes {stable_mosaic.version = 11 : i64} {
  func.func @bert_arch_head_kernel(%arg0: i32, %arg1: memref<16x768xbf16, #tpu.memory_space<vmem>>, %arg2: memref<768x512xbf16, #tpu.memory_space<vmem>>, %arg3: memref<1x512xf32, #tpu.memory_space<vmem>>, %arg4: memref<512x256xbf16, #tpu.memory_space<vmem>>, %arg5: memref<1x256xf32, #tpu.memory_space<vmem>>, %arg6: memref<256x128xbf16, #tpu.memory_space<vmem>>, %arg7: memref<1x128xf32, #tpu.memory_space<vmem>>, %arg8: memref<16x128xf32, #tpu.memory_space<vmem>>) attributes {dimension_semantics = [#tpu.dimension_semantics<parallel>], iteration_bounds = array<i64: 1>, scalar_prefetch = 0 : i64, scratch_operands = 0 : i64, tpu.core_type = #tpu.core_type<tc>, window_params = [{transform_indices = @transform_0, window_bounds = array<i64: 16, 768>}, {pipeline_mode = #tpu.pipeline_mode<synchronous>, transform_indices = @transform_1, window_bounds = array<i64: 768, 512>}, {pipeline_mode = #tpu.pipeline_mode<synchronous>, transform_indices = @transform_2, window_bounds = array<i64: 1, 512>}, {pipeline_mode = #tpu.pipeline_mode<synchronous>, transform_indices = @transform_3, window_bounds = array<i64: 512, 256>}, {pipeline_mode = #tpu.pipeline_mode<synchronous>, transform_indices = @transform_4, window_bounds = array<i64: 1, 256>}, {pipeline_mode = #tpu.pipeline_mode<synchronous>, transform_indices = @transform_5, window_bounds = array<i64: 256, 128>}, {pipeline_mode = #tpu.pipeline_mode<synchronous>, transform_indices = @transform_6, window_bounds = array<i64: 1, 128>}, {transform_indices = @transform_7, window_bounds = array<i64: 16, 128>}]} {
    %c0 = arith.constant 0 : index
    %c0_0 = arith.constant 0 : index
    %0 = vector.load %arg1[%c0, %c0_0] : memref<16x768xbf16, #tpu.memory_space<vmem>>, vector<16x768xbf16>
    %c0_1 = arith.constant 0 : index
    %c0_2 = arith.constant 0 : index
    %1 = vector.load %arg2[%c0_1, %c0_2] : memref<768x512xbf16, #tpu.memory_space<vmem>>, vector<768x512xbf16>
    %cst = arith.constant dense<0.000000e+00> : vector<16x512xf32>
    %2 = tpu.matmul %0, %1, %cst {dimension_numbers = #tpu.dot_dimension_numbers<[1], [0], [0], [1], [0, 0, 1, 1], [], []>} : vector<16x768xbf16>, vector<768x512xbf16>, vector<16x512xf32> -> vector<16x512xf32>
    %c0_3 = arith.constant 0 : index
    %c0_4 = arith.constant 0 : index
    %3 = vector.load %arg3[%c0_3, %c0_4] : memref<1x512xf32, #tpu.memory_space<vmem>>, vector<1x512xf32>
    %4 = vector.broadcast %3 : vector<1x512xf32> to vector<16x512xf32>
    %5 = arith.addf %2, %4 : vector<16x512xf32>
    %cst_5 = arith.constant 0.000000e+00 : f32
    %6 = vector.broadcast %cst_5 : f32 to vector<16x512xf32>
    %7 = arith.maximumf %5, %6 : vector<16x512xf32>
    %8 = arith.truncf %7 : vector<16x512xf32> to vector<16x512xbf16>
    %c0_6 = arith.constant 0 : index
    %c0_7 = arith.constant 0 : index
    %9 = vector.load %arg4[%c0_6, %c0_7] : memref<512x256xbf16, #tpu.memory_space<vmem>>, vector<512x256xbf16>
    %cst_8 = arith.constant dense<0.000000e+00> : vector<16x256xf32>
    %10 = tpu.matmul %8, %9, %cst_8 {dimension_numbers = #tpu.dot_dimension_numbers<[1], [0], [0], [1], [0, 0, 1, 1], [], []>} : vector<16x512xbf16>, vector<512x256xbf16>, vector<16x256xf32> -> vector<16x256xf32>
    %c0_9 = arith.constant 0 : index
    %c0_10 = arith.constant 0 : index
    %11 = vector.load %arg5[%c0_9, %c0_10] : memref<1x256xf32, #tpu.memory_space<vmem>>, vector<1x256xf32>
    %12 = vector.broadcast %11 : vector<1x256xf32> to vector<16x256xf32>
    %13 = arith.addf %10, %12 : vector<16x256xf32>
    %cst_11 = arith.constant 0.000000e+00 : f32
    %14 = vector.broadcast %cst_11 : f32 to vector<16x256xf32>
    %15 = arith.maximumf %13, %14 : vector<16x256xf32>
    %16 = arith.truncf %15 : vector<16x256xf32> to vector<16x256xbf16>
    %c0_12 = arith.constant 0 : index
    %c0_13 = arith.constant 0 : index
    %17 = vector.load %arg6[%c0_12, %c0_13] : memref<256x128xbf16, #tpu.memory_space<vmem>>, vector<256x128xbf16>
    %cst_14 = arith.constant dense<0.000000e+00> : vector<16x128xf32>
    %18 = tpu.matmul %16, %17, %cst_14 {dimension_numbers = #tpu.dot_dimension_numbers<[1], [0], [0], [1], [0, 0, 1, 1], [], []>} : vector<16x256xbf16>, vector<256x128xbf16>, vector<16x128xf32> -> vector<16x128xf32>
    %c0_15 = arith.constant 0 : index
    %c0_16 = arith.constant 0 : index
    %19 = vector.load %arg7[%c0_15, %c0_16] : memref<1x128xf32, #tpu.memory_space<vmem>>, vector<1x128xf32>
    %20 = vector.broadcast %19 : vector<1x128xf32> to vector<16x128xf32>
    %21 = arith.addf %18, %20 : vector<16x128xf32>
    %cst_17 = arith.constant dense<0xFF800000> : vector<16xf32>
    %22 = vector.multi_reduction <maximumf>, %21, %cst_17 [1] : vector<16x128xf32> to vector<16xf32>
    %23 = vector.shape_cast %22 : vector<16xf32> to vector<16x1xf32>
    %24 = vector.broadcast %23 : vector<16x1xf32> to vector<16x128xf32>
    %25 = arith.subf %21, %24 : vector<16x128xf32>
    %26 = math.exp %25 : vector<16x128xf32>
    %cst_18 = arith.constant dense<0.000000e+00> : vector<16xf32>
    %27 = vector.multi_reduction <add>, %26, %cst_18 [1] : vector<16x128xf32> to vector<16xf32>
    %28 = vector.shape_cast %27 : vector<16xf32> to vector<16x1xf32>
    %29 = math.log %28 : vector<16x1xf32>
    %30 = vector.broadcast %29 : vector<16x1xf32> to vector<16x128xf32>
    %31 = arith.subf %25, %30 : vector<16x128xf32>
    %c0_19 = arith.constant 0 : index
    %c0_20 = arith.constant 0 : index
    %32 = vector.load %arg8[%c0_19, %c0_20] : memref<16x128xf32, #tpu.memory_space<vmem>>, vector<16x128xf32>
    tpu.vector_store %arg8[%c0_19, %c0_20], %31 {strides = array<i32>} : memref<16x128xf32, #tpu.memory_space<vmem>>, vector<16x128xf32>,
    return
  }
  func.func @transform_0(%arg0: i32) -> (i32, i32) {
    %c0_i32 = arith.constant 0 : i32
    %c0_i32_0 = arith.constant 0 : i32
    return %arg0, %c0_i32 : i32, i32
  }
  func.func @transform_1(%arg0: i32) -> (i32, i32) {
    %c0_i32 = arith.constant 0 : i32
    %c0_i32_0 = arith.constant 0 : i32
    %c0_i32_1 = arith.constant 0 : i32
    return %c0_i32, %c0_i32_0 : i32, i32
  }
  func.func @transform_2(%arg0: i32) -> (i32, i32) {
    %c0_i32 = arith.constant 0 : i32
    %c0_i32_0 = arith.constant 0 : i32
    %c0_i32_1 = arith.constant 0 : i32
    return %c0_i32, %c0_i32_0 : i32, i32
  }
  func.func @transform_3(%arg0: i32) -> (i32, i32) {
    %c0_i32 = arith.constant 0 : i32
    %c0_i32_0 = arith.constant 0 : i32
    %c0_i32_1 = arith.constant 0 : i32
    return %c0_i32, %c0_i32_0 : i32, i32
  }
  func.func @transform_4(%arg0: i32) -> (i32, i32) {
    %c0_i32 = arith.constant 0 : i32
    %c0_i32_0 = arith.constant 0 : i32
    %c0_i32_1 = arith.constant 0 : i32
    return %c0_i32, %c0_i32_0 : i32, i32
  }
  func.func @transform_5(%arg0: i32) -> (i32, i32) {
    %c0_i32 = arith.constant 0 : i32
    %c0_i32_0 = arith.constant 0 : i32
    %c0_i32_1 = arith.constant 0 : i32
    return %c0_i32, %c0_i32_0 : i32, i32
  }
  func.func @transform_6(%arg0: i32) -> (i32, i32) {
    %c0_i32 = arith.constant 0 : i32
    %c0_i32_0 = arith.constant 0 : i32
    %c0_i32_1 = arith.constant 0 : i32
    return %c0_i32, %c0_i32_0 : i32, i32
  }
  func.func @transform_7(%arg0: i32) -> (i32, i32) {
    %c0_i32 = arith.constant 0 : i32
    %c0_i32_0 = arith.constant 0 : i32
    return %arg0, %c0_i32 : i32, i32
  }
}

</mosaic_0001>

<bundles_post_ra>
// kernel: tpu_custom_call.1
= control target key start
LH: loop header
LB: loop body
LE: loop exit
PB: predicated region body
PF: predicated region fallthrough
CT: control target
= control target key end

     0   :  { %12 = vsyncpa [#allocation3], 0  ;;  %s3317_s0 = inlined_call_operand.hbm [shape: bf16[16,768], index: 0, kind: input, shape index: {}]   ;;  %s3318_s1 = inlined_call_operand.hbm [shape: bf16[768,512], index: 1, kind: input, shape index: {}]   ;;  %s3319_s2 = inlined_call_operand.vmem [shape: f32[1,512], index: 2, kind: input, shape index: {}]   ;;  %s3320_s3 = inlined_call_operand.hbm [shape: bf16[512,256], index: 3, kind: input, shape index: {}]   ;;  %s3321_s4 = inlined_call_operand.vmem [shape: f32[1,256], index: 4, kind: input, shape index: {}]   ;;  %s3322_s5 = inlined_call_operand.hbm [shape: bf16[256,128], index: 5, kind: input, shape index: {}]   ;;  %s3323_s6 = inlined_call_operand.vmem [shape: f32[1,128], index: 6, kind: input, shape index: {}]   ;;  %s3324_s7 = inlined_call_operand.hbm [shape: f32[16,128], index: 7, kind: output, shape index: {}]  }
   0x1   :  { %13 = vsyncpa [#allocation6], 0 }
   0x2   :  { %14 = vsyncpa [#allocation9], 0 }
   0x3   :  { %15 = vsyncpa [#allocation4], 0  ;;  %s3149_s24 = smov [#allocation5]   ;;  %s3031_s28 = scalar_lea.hbm %s3318_s1, 24576 }
   0x4   :  { %s33_s25 = sshll.u32 %s3149_s24, 4  ;;  %p3032_p0 = scmp.ne.s32.totalorder %s3318_s1, %s3031_s28  ;;  %s34_s25 = int_to_ptr.vmem [resolvable:$true] %s33_s25 }
   0x5   :  { %p3035_p1 = scmp.lt.u32.totalorder %s3031_s28, %s3318_s1 }
   0x7   :  { %p3037_p2 = pnand %p3035_p1, %p3032_p0 }
   0x9   :  { %3040 = shalt.err (!%p3037_p2)
}
   0xa   :  { %s3041_s10 = scalar_lea.vmem %s34_s25, 24576  ;;  %p3046_p4 = scmp.lt.s32.totalorder %s34_s25, %s34_s25 }
   0xb   :  { %p3042_p3 = scmp.ne.s32.totalorder %s34_s25, %s3041_s10  ;;  %p3047_p5 = scmp.lt.s32.totalorder %s3041_s10, %s3041_s10 }
   0xd   :  { %p3048_p6 = por %p3047_p5, %p3046_p4 }
   0xf   :  { %p3049_p7 = pnand %p3048_p6, %p3042_p3 }
  0x11   :  { %3052 = shalt.err (!%p3049_p7)
}
  0x12   :  { %s3150_s11 = smov 256   ;;  %s3151_s12 = smov 16  }
  0x13   :  { %39 = dma.hbm_to_vmem [thread:$0]  %s3318_s1, 24576, %s34_s25, [#allocation6], %s3150_s11, %s3150_s11, %s3151_s12  }
  0x14   :  { %s3152_s15 = smov [#allocation2]   ;;  %s3053_s19 = scalar_lea.hbm %s3317_s0, 768 }
  0x15   :  { %s21_s16 = sshll.u32 %s3152_s15, 4  ;;  %p3054_p8 = scmp.ne.s32.totalorder %s3317_s0, %s3053_s19  ;;  %s22_s16 = int_to_ptr.vmem [resolvable:$true] %s21_s16 }
  0x16   :  { %p3057_p9 = scmp.lt.u32.totalorder %s3053_s19, %s3317_s0 }
  0x18   :  { %p3059_p10 = pnand %p3057_p9, %p3054_p8 }
  0x1a   :  { %3062 = shalt.err (!%p3059_p10)
}
  0x1b   :  { %s3063_s24 = scalar_lea.vmem %s22_s16, 768  ;;  %p3068_p12 = scmp.lt.s32.totalorder %s22_s16, %s22_s16 }
  0x1c   :  { %p3064_p11 = scmp.ne.s32.totalorder %s22_s16, %s3063_s24  ;;  %p3069_p13 = scmp.lt.s32.totalorder %s3063_s24, %s3063_s24 }
  0x1e   :  { %p3070_p0 = por %p3069_p13, %p3068_p12 }
  0x20   :  { %p3071_p1 = pnand %p3070_p0, %p3064_p11 }
  0x22   :  { %3074 = shalt.err (!%p3071_p1)
}
  0x23   :  { %s3153_s1 = smov 384   ;;  %s3154_s25 = smov 24  }
  0x24   :  { %27 = dma.hbm_to_vmem [thread:$0]  %s3317_s0, 768, %s22_s16, [#allocation3], %s3153_s1, %s3153_s1, %s3154_s25  }
  0x25   :  { %s3155_s28 = smov [#allocation7]   ;;  %s3075_s9 = scalar_lea.hbm %s3320_s3, 8192 }
  0x26   :  { %s47_s29 = sshll.u32 %s3155_s28, 4  ;;  %p3076_p2 = scmp.ne.s32.totalorder %s3320_s3, %s3075_s9  ;;  %s48_s29 = int_to_ptr.vmem [resolvable:$true] %s47_s29 }
  0x27   :  { %p3079_p3 = scmp.lt.u32.totalorder %s3075_s9, %s3320_s3 }
  0x29   :  { %p3081_p4 = pnand %p3079_p3, %p3076_p2 }
  0x2b   :  { %3084 = shalt.err (!%p3081_p4)
}
  0x2c   :  { %s3085_s14 = scalar_lea.vmem %s48_s29, 8192  ;;  %p3090_p6 = scmp.lt.s32.totalorder %s48_s29, %s48_s29 }
  0x2d   :  { %p3086_p5 = scmp.ne.s32.totalorder %s48_s29, %s3085_s14  ;;  %p3091_p7 = scmp.lt.s32.totalorder %s3085_s14, %s3085_s14 }
  0x2f   :  { %p3092_p8 = por %p3091_p7, %p3090_p6 }
  0x31   :  { %p3093_p9 = pnand %p3092_p8, %p3086_p5 }
  0x33   :  { %3096 = shalt.err (!%p3093_p9)
}
  0x34   :  { %s3156_s0 = smov 128   ;;  %s3157_s15 = smov 8  }
  0x35   :  { %53 = dma.hbm_to_vmem [thread:$0]  %s3320_s3, 8192, %s48_s29, [#allocation6], %s3156_s0, %s3156_s0, %s3157_s15  }
  0x36   :  { %s3158_s18 = smov [#allocation8]   ;;  %s3097_s22 = scalar_lea.hbm %s3322_s5, 2048 }
  0x37   :  { %s61_s19 = sshll.u32 %s3158_s18, 4  ;;  %p3098_p10 = scmp.ne.s32.totalorder %s3322_s5, %s3097_s22  ;;  %s62_s19 = int_to_ptr.vmem [resolvable:$true] %s61_s19 }
  0x38   :  { %p3101_p11 = scmp.lt.u32.totalorder %s3097_s22, %s3322_s5 }
  0x3a   :  { %p3103_p12 = pnand %p3101_p11, %p3098_p10 }
  0x3c   :  { %3106 = shalt.err (!%p3103_p12)
}
  0x3d   :  { %s3107_s26 = scalar_lea.vmem %s62_s19, 2048  ;;  %p3112_p0 = scmp.lt.s32.totalorder %s62_s19, %s62_s19 }
  0x3e   :  { %p3108_p13 = scmp.ne.s32.totalorder %s62_s19, %s3107_s26  ;;  %p3113_p1 = scmp.lt.s32.totalorder %s3107_s26, %s3107_s26 }
  0x40   :  { %p3114_p2 = por %p3113_p1, %p3112_p0 }
  0x42   :  { %p3115_p3 = pnand %p3114_p2, %p3108_p13 }
  0x44   :  { %3118 = shalt.err (!%p3115_p3)
}
  0x45   :  { %s3159_s3 = smov 64   ;;  %s3160_s27 = smov 4  }
  0x46   :  { %67 = dma.hbm_to_vmem [thread:$0]  %s3322_s5, 2048, %s62_s19, [#allocation9], %s3159_s3, %s3159_s3, %s3160_s27  }
  0x47   :  { %3141 = dma.done.wait [#allocation3], 768  }
  0x48   :  { %3142 = vsyncadd [#allocation3], 4294966528 }
  0x49   :  { %3143 = dma.done.wait [#allocation6], 32768  }
  0x4a   :  { %3144 = vsyncadd [#allocation6], 4294934528 }
  0x4b   :  { %3145 = dma.done.wait [#allocation9], 2048  }
  0x4c   :  { %3146 = vsyncadd [#allocation9], 4294965248  ;;  %v2614_v0 = vld [vmem:[#allocation5 + $0x4] ss:$16 sps:$4 sm:$0xff]   ;;  %v2618_v2 = vld [vmem:[#allocation5] ss:$16 sps:$4 sm:$0xff]  }
  0x4d   :  { %v2616_v1 = vld [vmem:[#allocation5 + $0x204] ss:$16 sps:$4 sm:$0xff]   ;;  %1293 = vmatprep.subr.bf16.mxu1 %v2614_v0  ;;  %v2619_v3 = vld [vmem:[#allocation5 + $0x200] ss:$16 sps:$4 sm:$0xff]  }
  0x4e   :  { %1336 = vmatprep.subr.bf16.mxu0 %v2616_v1  ;;  %v2620_v4 = vld [vmem:[#allocation5 + $0x24] ss:$16 sps:$4 sm:$0xff]   ;;  %1294 = vmatpush1.bf16.msra.mxu1 %v2618_v2  ;;  %v2624_v6 = vld [vmem:[#allocation5 + $0x20] ss:$16 sps:$4 sm:$0xff]  }
  0x4f   :  { %1337 = vmatpush1.bf16.msra.mxu0 %v2619_v3  ;;  %v2622_v5 = vld [vmem:[#allocation5 + $0x224] ss:$16 sps:$4 sm:$0xff]   ;;  %1295 = vmatprep.subr.bf16.mxu1 %v2620_v4  ;;  %v2625_v7 = vld [vmem:[#allocation5 + $0x220] ss:$16 sps:$4 sm:$0xff]   ;;  %v2721_v3 = vld [vmem:[#allocation5 + $0xc] ss:$16 sps:$4 sm:$0xff]  }
  0x50   :  { %1338 = vmatprep.subr.bf16.mxu0 %v2622_v5  ;;  %v2626_v8 = vld [vmem:[#allocation5 + $0x44] ss:$16 sps:$4 sm:$0xff]   ;;  %v2630_v10 = vld [vmem:[#allocation5 + $0x40] ss:$16 sps:$4 sm:$0xff]  }
  0x51   :  { %v2628_v9 = vld [vmem:[#allocation5 + $0x244] ss:$16 sps:$4 sm:$0xff]   ;;  %v2631_v11 = vld [vmem:[#allocation5 + $0x240] ss:$16 sps:$4 sm:$0xff]  }
  0x52   :  { %1296 = vmatpush1.bf16.msra.mxu1 %v2624_v6  ;;  %v2632_v12 = vld [vmem:[#allocation5 + $0x64] ss:$16 sps:$4 sm:$0xff]   ;;  %v2636_v14 = vld [vmem:[#allocation5 + $0x60] ss:$16 sps:$4 sm:$0xff]  }
  0x53   :  { %1339 = vmatpush1.bf16.msra.mxu0 %v2625_v7  ;;  %1297 = vmatprep.subr.bf16.mxu1 %v2626_v8  ;;  %v2634_v13 = vld [vmem:[#allocation5 + $0x264] ss:$16 sps:$4 sm:$0xff]   ;;  %v2637_v15 = vld [vmem:[#allocation5 + $0x260] ss:$16 sps:$4 sm:$0xff]   ;;  %v2719_v7 = vld [vmem:[#allocation5 + $0x8] ss:$16 sps:$4 sm:$0xff]  }
  0x54   :  { %1340 = vmatprep.subr.bf16.mxu0 %v2628_v9  ;;  %v2638_v16 = vld [vmem:[#allocation5 + $0x84] ss:$16 sps:$4 sm:$0xff]   ;;  %v2642_v18 = vld [vmem:[#allocation5 + $0x80] ss:$16 sps:$4 sm:$0xff]   ;;  %v2727_v9 = vld [vmem:[#allocation5 + $0x2c] ss:$16 sps:$4 sm:$0xff]  }
  0x55   :  { %v2640_v17 = vld [vmem:[#allocation5 + $0x284] ss:$16 sps:$4 sm:$0xff]   ;;  %v2643_v19 = vld [vmem:[#allocation5 + $0x280] ss:$16 sps:$4 sm:$0xff]  }
  0x56   :  { %1298 = vmatpush1.bf16.msra.mxu1 %v2630_v10  ;;  %v2644_v20 = vld [vmem:[#allocation5 + $0xa4] ss:$16 sps:$4 sm:$0xff]   ;;  %v2648_v22 = vld [vmem:[#allocation5 + $0xa0] ss:$16 sps:$4 sm:$0xff]  }
  0x57   :  { %1341 = vmatpush1.bf16.msra.mxu0 %v2631_v11  ;;  %1299 = vmatprep.subr.bf16.mxu1 %v2632_v12  ;;  %v2646_v21 = vld [vmem:[#allocation5 + $0x2a4] ss:$16 sps:$4 sm:$0xff]   ;;  %v2649_v23 = vld [vmem:[#allocation5 + $0x2a0] ss:$16 sps:$4 sm:$0xff]   ;;  %v2725_v11 = vld [vmem:[#allocation5 + $0x28] ss:$16 sps:$4 sm:$0xff]  }
  0x58   :  { %1342 = vmatprep.subr.bf16.mxu0 %v2634_v13  ;;  %v2650_v24 = vld [vmem:[#allocation5 + $0xc4] ss:$16 sps:$4 sm:$0xff]   ;;  %v2654_v26 = vld [vmem:[#allocation5 + $0xc0] ss:$16 sps:$4 sm:$0xff]   ;;  %v2733_v13 = vld [vmem:[#allocation5 + $0x4c] ss:$16 sps:$4 sm:$0xff]  }
  0x59   :  { %v2652_v25 = vld [vmem:[#allocation5 + $0x2c4] ss:$16 sps:$4 sm:$0xff]   ;;  %v2655_v27 = vld [vmem:[#allocation5 + $0x2c0] ss:$16 sps:$4 sm:$0xff]  }
  0x5a   :  { %1300 = vmatpush1.bf16.msra.mxu1 %v2636_v14  ;;  %v2656_v28 = vld [vmem:[#allocation5 + $0xe4] ss:$16 sps:$4 sm:$0xff]   ;;  %v2660_v30 = vld [vmem:[#allocation5 + $0xe0] ss:$16 sps:$4 sm:$0xff]  }
  0x5b   :  { %1343 = vmatpush1.bf16.msra.mxu0 %v2637_v15  ;;  %1301 = vmatprep.subr.bf16.mxu1 %v2638_v16  ;;  %v2658_v29 = vld [vmem:[#allocation5 + $0x2e4] ss:$16 sps:$4 sm:$0xff]   ;;  %v2661_v31 = vld [vmem:[#allocation5 + $0x2e0] ss:$16 sps:$4 sm:$0xff]   ;;  %v2731_v15 = vld [vmem:[#allocation5 + $0x48] ss:$16 sps:$4 sm:$0xff]  }
  0x5c   :  { %1344 = vmatprep.subr.bf16.mxu0 %v2640_v17  ;;  %v2662_v32 = vld [vmem:[#allocation5 + $0x104] ss:$16 sps:$4 sm:$0xff]   ;;  %v2666_v34 = vld [vmem:[#allocation5 + $0x100] ss:$16 sps:$4 sm:$0xff]   ;;  %v2739_v17 = vld [vmem:[#allocation5 + $0x6c] ss:$16 sps:$4 sm:$0xff]  }
  0x5d   :  { %v2664_v33 = vld [vmem:[#allocation5 + $0x304] ss:$16 sps:$4 sm:$0xff]   ;;  %v2667_v35 = vld [vmem:[#allocation5 + $0x300] ss:$16 sps:$4 sm:$0xff]  }
  0x5e   :  { %1302 = vmatpush1.bf16.msra.mxu1 %v2642_v18  ;;  %v2668_v36 = vld [vmem:[#allocation5 + $0x124] ss:$16 sps:$4 sm:$0xff]   ;;  %v2672_v38 = vld [vmem:[#allocation5 + $0x120] ss:$16 sps:$4 sm:$0xff]  }
  0x5f   :  { %1345 = vmatpush1.bf16.msra.mxu0 %v2643_v19  ;;  %1303 = vmatprep.subr.bf16.mxu1 %v2644_v20  ;;  %v2670_v37 = vld [vmem:[#allocation5 + $0x324] ss:$16 sps:$4 sm:$0xff]   ;;  %v2673_v39 = vld [vmem:[#allocation5 + $0x320] ss:$16 sps:$4 sm:$0xff]   ;;  %v2737_v19 = vld [vmem:[#allocation5 + $0x68] ss:$16 sps:$4 sm:$0xff]  }
  0x60   :  { %1346 = vmatprep.subr.bf16.mxu0 %v2646_v21  ;;  %v2674_v40 = vld [vmem:[#allocation5 + $0x144] ss:$16 sps:$4 sm:$0xff]   ;;  %v2678_v42 = vld [vmem:[#allocation5 + $0x140] ss:$16 sps:$4 sm:$0xff]   ;;  %v2745_v21 = vld [vmem:[#allocation5 + $0x8c] ss:$16 sps:$4 sm:$0xff]  }
  0x61   :  { %v2676_v41 = vld [vmem:[#allocation5 + $0x344] ss:$16 sps:$4 sm:$0xff]   ;;  %v2679_v43 = vld [vmem:[#allocation5 + $0x340] ss:$16 sps:$4 sm:$0xff]  }
  0x62   :  { %1304 = vmatpush1.bf16.msra.mxu1 %v2648_v22  ;;  %v2680_v44 = vld [vmem:[#allocation5 + $0x164] ss:$16 sps:$4 sm:$0xff]   ;;  %v2684_v46 = vld [vmem:[#allocation5 + $0x160] ss:$16 sps:$4 sm:$0xff]  }
  0x63   :  { %1347 = vmatpush1.bf16.msra.mxu0 %v2649_v23  ;;  %1305 = vmatprep.subr.bf16.mxu1 %v2650_v24  ;;  %v2682_v45 = vld [vmem:[#allocation5 + $0x364] ss:$16 sps:$4 sm:$0xff]   ;;  %v2685_v47 = vld [vmem:[#allocation5 + $0x360] ss:$16 sps:$4 sm:$0xff]   ;;  %v2743_v23 = vld [vmem:[#allocation5 + $0x88] ss:$16 sps:$4 sm:$0xff]  }
  0x64   :  { %1348 = vmatprep.subr.bf16.mxu0 %v2652_v25  ;;  %v2686_v48 = vld [vmem:[#allocation5 + $0x184] ss:$16 sps:$4 sm:$0xff]   ;;  %v2690_v52 = vld [vmem:[#allocation5 + $0x180] ss:$16 sps:$4 sm:$0xff]   ;;  %v2751_v25 = vld [vmem:[#allocation5 + $0xac] ss:$16 sps:$4 sm:$0xff]  }
  0x65   :  { %v2712_v49 = vld [vmem:[#allocation2 + $0x4] ss:$24 sps:$4 sm:$0xff]   ;;  %v2691_v53 = vld [vmem:[#allocation5 + $0x380] ss:$16 sps:$4 sm:$0xff]  }
  0x66   :  { %1306 = vmatpush1.bf16.msra.mxu1 %v2654_v26  ;;  %v2688_v50 = vld [vmem:[#allocation5 + $0x384] ss:$16 sps:$4 sm:$0xff]   ;;  %1325 = vmatprep.mubr.bf16.mxu1 %v2712_v49  ;;  %v2696_v56 = vld [vmem:[#allocation5 + $0x1a0] ss:$16 sps:$4 sm:$0xff]  }
  0x67   :  { %1349 = vmatpush1.bf16.msra.mxu0 %v2655_v27  ;;  %1307 = vmatprep.subr.bf16.mxu1 %v2656_v28  ;;  %v3253_v51 = vld [vmem:[#allocation2 + $0xc] ss:$24 sps:$4 sm:$0xff]   ;;  %v2697_v57 = vld [vmem:[#allocation5 + $0x3a0] ss:$16 sps:$4 sm:$0xff]   ;;  %v2749_v27 = vld [vmem:[#allocation5 + $0xa8] ss:$16 sps:$4 sm:$0xff]  }
  0x68   :  { %1350 = vmatprep.subr.bf16.mxu0 %v2658_v29  ;;  %1368 = vmatprep.mubr.bf16.mxu0 %v3253_v51  ;;  %v2692_v54 = vld [vmem:[#allocation5 + $0x1a4] ss:$16 sps:$4 sm:$0xff]   ;;  %v2702_v60 = vld [vmem:[#allocation5 + $0x1c0] ss:$16 sps:$4 sm:$0xff]   ;;  %v2757_v29 = vld [vmem:[#allocation5 + $0xcc] ss:$16 sps:$4 sm:$0xff]  }
  0x69   :  { %v2694_v55 = vld [vmem:[#allocation5 + $0x3a4] ss:$16 sps:$4 sm:$0xff]   ;;  %v2703_v61 = vld [vmem:[#allocation5 + $0x3c0] ss:$16 sps:$4 sm:$0xff]  }
  0x6a   :  { %1308 = vmatpush1.bf16.msra.mxu1 %v2660_v30  ;;  %v2698_v58 = vld [vmem:[#allocation5 + $0x1c4] ss:$16 sps:$4 sm:$0xff]   ;;  %v2708_v0 = vld [vmem:[#allocation5 + $0x1e0] ss:$16 sps:$4 sm:$0xff]  }
  0x6b   :  { %1351 = vmatpush1.bf16.msra.mxu0 %v2661_v31  ;;  %1309 = vmatprep.subr.bf16.mxu1 %v2662_v32  ;;  %v2700_v59 = vld [vmem:[#allocation5 + $0x3c4] ss:$16 sps:$4 sm:$0xff]   ;;  %v2709_v1 = vld [vmem:[#allocation5 + $0x3e0] ss:$16 sps:$4 sm:$0xff]   ;;  %v2755_v31 = vld [vmem:[#allocation5 + $0xc8] ss:$16 sps:$4 sm:$0xff]  }
  0x6c   :  { %1352 = vmatprep.subr.bf16.mxu0 %v2664_v33  ;;  %v2704_v62 = vld [vmem:[#allocation5 + $0x1e4] ss:$16 sps:$4 sm:$0xff]   ;;  %v3256_v4 = vld [vmem:[#allocation2] ss:$24 sps:$4 sm:$0xff]   ;;  %v2763_v33 = vld [vmem:[#allocation5 + $0xec] ss:$16 sps:$4 sm:$0xff]  }
  0x6d   :  { %v2706_v63 = vld [vmem:[#allocation5 + $0x3e4] ss:$16 sps:$4 sm:$0xff]   ;;  %v3258_v5 = vld [vmem:[#allocation2 + $0x8] ss:$24 sps:$4 sm:$0xff]  }
  0x6e   :  { %1310 = vmatpush1.bf16.msra.mxu1 %v2666_v34  ;;  %v2718_v2 = vld [vmem:[#allocation5 + $0x404] ss:$16 sps:$4 sm:$0xff]   ;;  %v2716_v6 = vld [vmem:[#allocation5 + $0x400] ss:$16 sps:$4 sm:$0xff]  }
  0x6f   :  { %1353 = vmatpush1.bf16.msra.mxu0 %v2667_v35  ;;  %1311 = vmatprep.subr.bf16.mxu1 %v2668_v36  ;;  %v2724_v8 = vld [vmem:[#allocation5 + $0x424] ss:$16 sps:$4 sm:$0xff]   ;;  %v2722_v10 = vld [vmem:[#allocation5 + $0x420] ss:$16 sps:$4 sm:$0xff]   ;;  %v2761_v36 = vld [vmem:[#allocation5 + $0xe8] ss:$16 sps:$4 sm:$0xff]  }
  0x70   :  { %1354 = vmatprep.subr.bf16.mxu0 %v2670_v37  ;;  %v2730_v12 = vld [vmem:[#allocation5 + $0x444] ss:$16 sps:$4 sm:$0xff]   ;;  %v2728_v14 = vld [vmem:[#allocation5 + $0x440] ss:$16 sps:$4 sm:$0xff]  }
  0x71   :  { %v2736_v16 = vld [vmem:[#allocation5 + $0x464] ss:$16 sps:$4 sm:$0xff]   ;;  %v2734_v18 = vld [vmem:[#allocation5 + $0x460] ss:$16 sps:$4 sm:$0xff]  }
  0x72   :  { %1312 = vmatpush1.bf16.msra.mxu1 %v2672_v38  ;;  %v2742_v20 = vld [vmem:[#allocation5 + $0x484] ss:$16 sps:$4 sm:$0xff]   ;;  %v2740_v22 = vld [vmem:[#allocation5 + $0x480] ss:$16 sps:$4 sm:$0xff]   ;;  %v2769_v38 = vld [vmem:[#allocation5 + $0x10c] ss:$16 sps:$4 sm:$0xff]  }
  0x73   :  { %1355 = vmatpush1.bf16.msra.mxu0 %v2673_v39  ;;  %1313 = vmatprep.subr.bf16.mxu1 %v2674_v40  ;;  %v2748_v24 = vld [vmem:[#allocation5 + $0x4a4] ss:$16 sps:$4 sm:$0xff]   ;;  %v2746_v26 = vld [vmem:[#allocation5 + $0x4a0] ss:$16 sps:$4 sm:$0xff]   ;;  %v2767_v40 = vld [vmem:[#allocation5 + $0x108] ss:$16 sps:$4 sm:$0xff]  }
  0x74   :  { %1356 = vmatprep.subr.bf16.mxu0 %v2676_v41  ;;  %v2754_v28 = vld [vmem:[#allocation5 + $0x4c4] ss:$16 sps:$4 sm:$0xff]   ;;  %v2752_v30 = vld [vmem:[#allocation5 + $0x4c0] ss:$16 sps:$4 sm:$0xff]  }
  0x75   :  { %v2760_v32 = vld [vmem:[#allocation5 + $0x4e4] ss:$16 sps:$4 sm:$0xff]   ;;  %v2758_v35 = vld [vmem:[#allocation5 + $0x4e0] ss:$16 sps:$4 sm:$0xff]  }
  0x76   :  { %1314 = vmatpush1.bf16.msra.mxu1 %v2678_v42  ;;  %v3262_v34 = vld [vmem:[#allocation2 + $0x14] ss:$24 sps:$4 sm:$0xff]   ;;  %v2764_v39 = vld [vmem:[#allocation5 + $0x500] ss:$16 sps:$4 sm:$0xff]  }
  0x77   :  { %1357 = vmatpush1.bf16.msra.mxu0 %v2679_v43  ;;  %1315 = vmatprep.subr.bf16.mxu1 %v2680_v44  ;;  %v2766_v37 = vld [vmem:[#allocation5 + $0x504] ss:$16 sps:$4 sm:$0xff]   ;;  %v2775_v42 = vld [vmem:[#allocation5 + $0x12c] ss:$16 sps:$4 sm:$0xff]   ;;  %v2770_v43 = vld [vmem:[#allocation5 + $0x520] ss:$16 sps:$4 sm:$0xff]  }
  0x78   :  { %1358 = vmatprep.subr.bf16.mxu0 %v2682_v45  ;;  %v2772_v41 = vld [vmem:[#allocation5 + $0x524] ss:$16 sps:$4 sm:$0xff]   ;;  %v2773_v44 = vld [vmem:[#allocation5 + $0x128] ss:$16 sps:$4 sm:$0xff]  }
  0x79   :  { %v2778_v45 = vld [vmem:[#allocation5 + $0x544] ss:$16 sps:$4 sm:$0xff]  }
  0x7a   :  { %1316 = vmatpush1.bf16.msra.mxu1 %v2684_v46  ;;  %v2781_v46 = vld [vmem:[#allocation5 + $0x14c] ss:$16 sps:$4 sm:$0xff]  }
  0x7b   :  { %1359 = vmatpush1.bf16.msra.mxu0 %v2685_v47  ;;  %1317 = vmatprep.subr.bf16.mxu1 %v2686_v48  ;;  %v2776_v47 = vld [vmem:[#allocation5 + $0x540] ss:$16 sps:$4 sm:$0xff]   ;;  %v2779_v48 = vld [vmem:[#allocation5 + $0x148] ss:$16 sps:$4 sm:$0xff]  }
  0x7c   :  { %1360 = vmatprep.subr.bf16.mxu0 %v2688_v50  ;;  %v2787_v50 = vld [vmem:[#allocation5 + $0x16c] ss:$16 sps:$4 sm:$0xff]  }
  0x7e   :  { %1318 = vmatpush1.bf16.msra.mxu1 %v2690_v52  ;;  %v2782_v52 = vld [vmem:[#allocation5 + $0x560] ss:$16 sps:$4 sm:$0xff]  }
  0x7f   :  { %1361 = vmatpush1.bf16.msra.mxu0 %v2691_v53  ;;  %1319 = vmatprep.subr.bf16.mxu1 %v2692_v54  ;;  %v2785_v53 = vld [vmem:[#allocation5 + $0x168] ss:$16 sps:$4 sm:$0xff]   ;;  %v2790_v54 = vld [vmem:[#allocation5 + $0x584] ss:$16 sps:$4 sm:$0xff]  }
  0x80   :  { %1362 = vmatprep.subr.bf16.mxu0 %v2694_v55  ;;  %v2793_v55 = vld [vmem:[#allocation5 + $0x18c] ss:$16 sps:$4 sm:$0xff]  }
  0x82   :  { %1320 = vmatpush1.bf16.msra.mxu1 %v2696_v56  ;;  %v2788_v56 = vld [vmem:[#allocation5 + $0x580] ss:$16 sps:$4 sm:$0xff]  }
  0x83   :  { %1363 = vmatpush1.bf16.msra.mxu0 %v2697_v57  ;;  %1321 = vmatprep.subr.bf16.mxu1 %v2698_v58  ;;  %v2791_v57 = vld [vmem:[#allocation5 + $0x188] ss:$16 sps:$4 sm:$0xff]   ;;  %v2796_v58 = vld [vmem:[#allocation5 + $0x5a4] ss:$16 sps:$4 sm:$0xff]  }
  0x84   :  { %1364 = vmatprep.subr.bf16.mxu0 %v2700_v59  ;;  %v2799_v59 = vld [vmem:[#allocation5 + $0x1ac] ss:$16 sps:$4 sm:$0xff]  }
  0x86   :  { %1322 = vmatpush1.bf16.msra.mxu1 %v2702_v60  ;;  %v2794_v60 = vld [vmem:[#allocation5 + $0x5a0] ss:$16 sps:$4 sm:$0xff]  }
  0x87   :  { %1365 = vmatpush1.bf16.msra.mxu0 %v2703_v61  ;;  %1323 = vmatprep.subr.bf16.mxu1 %v2704_v62  ;;  %v2797_v61 = vld [vmem:[#allocation5 + $0x1a8] ss:$16 sps:$4 sm:$0xff]   ;;  %v2802_v62 = vld [vmem:[#allocation5 + $0x5c4] ss:$16 sps:$4 sm:$0xff]  }
  0x88   :  { %1366 = vmatprep.subr.bf16.mxu0 %v2706_v63  ;;  %v2805_v63 = vld [vmem:[#allocation5 + $0x1cc] ss:$16 sps:$4 sm:$0xff]  }
  0x8a   :  { %1324 = vmatpush1.bf16.msra.mxu1 %v2708_v0  ;;  %v2800_v0 = vld [vmem:[#allocation5 + $0x5c0] ss:$16 sps:$4 sm:$0xff]  }
  0x8b   :  { %1367 = vmatpush1.bf16.msra.mxu0 %v2709_v1  ;;  %1422 = vmatprep.subr.bf16.mxu1 %v2721_v3  ;;  %v2803_v1 = vld [vmem:[#allocation5 + $0x1c8] ss:$16 sps:$4 sm:$0xff]   ;;  %v2811_v3 = vld [vmem:[#allocation5 + $0x1ec] ss:$16 sps:$4 sm:$0xff]  }
  0x8c   :  { %1379 = vmatprep.subr.bf16.mxu0 %v2718_v2  ;;  %v2808_v2 = vld [vmem:[#allocation5 + $0x5e4] ss:$16 sps:$4 sm:$0xff]  }
  0x8d   :  { %1326 = vmatmul.mubr.bf16.vlgmr.msra.gmra.mrb[0].mxu1 %v3256_v4 }
  0x8e   :  { %1369 = vmatmul.mubr.bf16.vlgmr.msra.gmra.mrb[0].mxu0 %v3258_v5  ;;  %1423 = vmatpush1.bf16.msra.mxu1 %v2719_v7  ;;  %v2809_v7 = vld [vmem:[#allocation5 + $0x1e8] ss:$16 sps:$4 sm:$0xff]  }
  0x8f   :  { %1380 = vmatpush1.bf16.msra.mxu0 %v2716_v6  ;;  %1424 = vmatprep.subr.bf16.mxu1 %v2727_v9  ;;  %v2806_v6 = vld [vmem:[#allocation5 + $0x5e0] ss:$16 sps:$4 sm:$0xff]  }
  0x90   :  { %1381 = vmatprep.subr.bf16.mxu0 %v2724_v8  ;;  %1454 = vmatprep.mubr.bf16.mxu1 %v2712_v49  ;;  %v2784_v49 = vld [vmem:[#allocation5 + $0x564] ss:$16 sps:$4 sm:$0xff]   ;;  %v2817_v8 = vld [vmem:[#allocation5 + $0x20c] ss:$16 sps:$4 sm:$0xff]   ;;  %v3265_v9 = vld [vmem:[#allocation2 + $0x10] ss:$24 sps:$4 sm:$0xff]  }
  0x91   :  { %1411 = vmatprep.mubr.bf16.mxu0 %v3262_v34 }
  0x92   :  { %1425 = vmatpush1.bf16.msra.mxu1 %v2725_v11  ;;  %v2820_v11 = vld [vmem:[#allocation5 + $0x22c] ss:$16 sps:$4 sm:$0xff]  }
  0x93   :  { %1382 = vmatpush1.bf16.msra.mxu0 %v2722_v10  ;;  %1426 = vmatprep.subr.bf16.mxu1 %v2733_v13  ;;  %v2815_v10 = vld [vmem:[#allocation5 + $0x208] ss:$16 sps:$4 sm:$0xff]   ;;  %v2823_v13 = vld [vmem:[#allocation5 + $0x24c] ss:$16 sps:$4 sm:$0xff]  }
  0x94   :  { %1383 = vmatprep.subr.bf16.mxu0 %v2730_v12  ;;  %v2818_v12 = vld [vmem:[#allocation5 + $0x228] ss:$16 sps:$4 sm:$0xff]  }
  0x96   :  { %1427 = vmatpush1.bf16.msra.mxu1 %v2731_v15  ;;  %v2826_v15 = vld [vmem:[#allocation5 + $0x26c] ss:$16 sps:$4 sm:$0xff]  }
  0x97   :  { %1384 = vmatpush1.bf16.msra.mxu0 %v2728_v14  ;;  %1428 = vmatprep.subr.bf16.mxu1 %v2739_v17  ;;  %v2821_v14 = vld [vmem:[#allocation5 + $0x248] ss:$16 sps:$4 sm:$0xff]   ;;  %v2829_v17 = vld [vmem:[#allocation5 + $0x28c] ss:$16 sps:$4 sm:$0xff]  }
  0x98   :  { %1385 = vmatprep.subr.bf16.mxu0 %v2736_v16  ;;  %v2824_v16 = vld [vmem:[#allocation5 + $0x268] ss:$16 sps:$4 sm:$0xff]  }
  0x9a   :  { %1429 = vmatpush1.bf16.msra.mxu1 %v2737_v19  ;;  %v2832_v19 = vld [vmem:[#allocation5 + $0x2ac] ss:$16 sps:$4 sm:$0xff]  }
  0x9b   :  { %1386 = vmatpush1.bf16.msra.mxu0 %v2734_v18  ;;  %1430 = vmatprep.subr.bf16.mxu1 %v2745_v21  ;;  %v2827_v18 = vld [vmem:[#allocation5 + $0x288] ss:$16 sps:$4 sm:$0xff]  }
  0x9c   :  { %1387 = vmatprep.subr.bf16.mxu0 %v2742_v20  ;;  %v2830_v20 = vld [vmem:[#allocation5 + $0x2a8] ss:$16 sps:$4 sm:$0xff]  }
  0x9d   :  { %v2833_v21 = vld [vmem:[#allocation5 + $0x2c8] ss:$16 sps:$4 sm:$0xff]  }
  0x9e   :  { %1431 = vmatpush1.bf16.msra.mxu1 %v2743_v23  ;;  %v2913_v23 = vld [vmem:[#allocation7 + $0x4] ss:$8 sps:$4 sm:$0xff]  }
  0x9f   :  { %1388 = vmatpush1.bf16.msra.mxu0 %v2740_v22  ;;  %1432 = vmatprep.subr.bf16.mxu1 %v2751_v25  ;;  %v2838_v22 = vld [vmem:[#allocation5 + $0x2ec] ss:$16 sps:$4 sm:$0xff]   ;;  %v2836_v25 = vld [vmem:[#allocation5 + $0x2e8] ss:$16 sps:$4 sm:$0xff]  }
  0xa0   :  { %1389 = vmatprep.subr.bf16.mxu0 %v2748_v24  ;;  %v2916_v24 = vld [vmem:[#allocation7 + $0x14] ss:$8 sps:$4 sm:$0xff]  }
  0xa2   :  { %1433 = vmatpush1.bf16.msra.mxu1 %v2749_v27  ;;  %v2914_v27 = vld [vmem:[#allocation7 + $0x10] ss:$8 sps:$4 sm:$0xff]  }
  0xa3   :  { %1390 = vmatpush1.bf16.msra.mxu0 %v2746_v26  ;;  %1434 = vmatprep.subr.bf16.mxu1 %v2757_v29  ;;  %v2841_v26 = vld [vmem:[#allocation5 + $0x30c] ss:$16 sps:$4 sm:$0xff]   ;;  %v2839_v29 = vld [vmem:[#allocation5 + $0x308] ss:$16 sps:$4 sm:$0xff]  }
  0xa4   :  { %1391 = vmatprep.subr.bf16.mxu0 %v2754_v28  ;;  %v2919_v28 = vld [vmem:[#allocation7 + $0x24] ss:$8 sps:$4 sm:$0xff]  }
  0xa6   :  { %1435 = vmatpush1.bf16.msra.mxu1 %v2755_v31  ;;  %v2917_v31 = vld [vmem:[#allocation7 + $0x20] ss:$8 sps:$4 sm:$0xff]  }
  0xa7   :  { %1392 = vmatpush1.bf16.msra.mxu0 %v2752_v30  ;;  %1436 = vmatprep.subr.bf16.mxu1 %v2763_v33  ;;  %v2844_v30 = vld [vmem:[#allocation5 + $0x32c] ss:$16 sps:$4 sm:$0xff]  }
  0xa8   :  { %1393 = vmatprep.subr.bf16.mxu0 %v2760_v32  ;;  %v2842_v32 = vld [vmem:[#allocation5 + $0x328] ss:$16 sps:$4 sm:$0xff]   ;;  %v2922_v33 = vld [vmem:[#allocation7 + $0x34] ss:$8 sps:$4 sm:$0xff]  }
  0xaa   :  { %1437 = vmatpush1.bf16.msra.mxu1 %v2761_v36  ;;  %v2920_v36 = vld [vmem:[#allocation7 + $0x30] ss:$8 sps:$4 sm:$0xff]  }
  0xab   :  { %1394 = vmatpush1.bf16.msra.mxu0 %v2758_v35  ;;  %1438 = vmatprep.subr.bf16.mxu1 %v2769_v38  ;;  %v2847_v35 = vld [vmem:[#allocation5 + $0x34c] ss:$16 sps:$4 sm:$0xff]   ;;  %v2845_v38 = vld [vmem:[#allocation5 + $0x348] ss:$16 sps:$4 sm:$0xff]  }
  0xac   :  { %1395 = vmatprep.subr.bf16.mxu0 %v2766_v37  ;;  %v2925_v37 = vld [vmem:[#allocation7 + $0x44] ss:$8 sps:$4 sm:$0xff]  }
  0xae   :  { %1439 = vmatpush1.bf16.msra.mxu1 %v2767_v40  ;;  %v2923_v40 = vld [vmem:[#allocation7 + $0x40] ss:$8 sps:$4 sm:$0xff]  }
  0xaf   :  { %1396 = vmatpush1.bf16.msra.mxu0 %v2764_v39  ;;  %1440 = vmatprep.subr.bf16.mxu1 %v2775_v42  ;;  %v2850_v39 = vld [vmem:[#allocation5 + $0x36c] ss:$16 sps:$4 sm:$0xff]   ;;  %v2848_v42 = vld [vmem:[#allocation5 + $0x368] ss:$16 sps:$4 sm:$0xff]  }
  0xb0   :  { %1397 = vmatprep.subr.bf16.mxu0 %v2772_v41  ;;  %v2928_v41 = vld [vmem:[#allocation7 + $0x54] ss:$8 sps:$4 sm:$0xff]  }
  0xb2   :  { %1441 = vmatpush1.bf16.msra.mxu1 %v2773_v44  ;;  %v2926_v44 = vld [vmem:[#allocation7 + $0x50] ss:$8 sps:$4 sm:$0xff]  }
  0xb3   :  { %1398 = vmatpush1.bf16.msra.mxu0 %v2770_v43  ;;  %1442 = vmatprep.subr.bf16.mxu1 %v2781_v46  ;;  %v2853_v43 = vld [vmem:[#allocation5 + $0x38c] ss:$16 sps:$4 sm:$0xff]   ;;  %v2851_v46 = vld [vmem:[#allocation5 + $0x388] ss:$16 sps:$4 sm:$0xff]  }
  0xb4   :  { %1399 = vmatprep.subr.bf16.mxu0 %v2778_v45  ;;  %v2931_v45 = vld [vmem:[#allocation7 + $0x64] ss:$8 sps:$4 sm:$0xff]  }
  0xb6   :  { %1443 = vmatpush1.bf16.msra.mxu1 %v2779_v48  ;;  %v2929_v48 = vld [vmem:[#allocation7 + $0x60] ss:$8 sps:$4 sm:$0xff]  }
  0xb7   :  { %1400 = vmatpush1.bf16.msra.mxu0 %v2776_v47  ;;  %1444 = vmatprep.subr.bf16.mxu1 %v2787_v50  ;;  %v2856_v47 = vld [vmem:[#allocation5 + $0x3ac] ss:$16 sps:$4 sm:$0xff]   ;;  %v2854_v50 = vld [vmem:[#allocation5 + $0x3a8] ss:$16 sps:$4 sm:$0xff]  }
  0xb8   :  { %1401 = vmatprep.subr.bf16.mxu0 %v2784_v49  ;;  %v2934_v49 = vld [vmem:[#allocation7 + $0x74] ss:$8 sps:$4 sm:$0xff]  }
  0xba   :  { %1445 = vmatpush1.bf16.msra.mxu1 %v2785_v53  ;;  %v2932_v53 = vld [vmem:[#allocation7 + $0x70] ss:$8 sps:$4 sm:$0xff]  }
  0xbb   :  { %1402 = vmatpush1.bf16.msra.mxu0 %v2782_v52  ;;  %1446 = vmatprep.subr.bf16.mxu1 %v2793_v55  ;;  %v2859_v52 = vld [vmem:[#allocation5 + $0x3cc] ss:$16 sps:$4 sm:$0xff]   ;;  %v2857_v55 = vld [vmem:[#allocation5 + $0x3c8] ss:$16 sps:$4 sm:$0xff]  }
  0xbc   :  { %1403 = vmatprep.subr.bf16.mxu0 %v2790_v54  ;;  %v2937_v54 = vld [vmem:[#allocation7 + $0x84] ss:$8 sps:$4 sm:$0xff]  }
  0xbe   :  { %1447 = vmatpush1.bf16.msra.mxu1 %v2791_v57  ;;  %v2935_v57 = vld [vmem:[#allocation7 + $0x80] ss:$8 sps:$4 sm:$0xff]  }
  0xbf   :  { %1404 = vmatpush1.bf16.msra.mxu0 %v2788_v56  ;;  %1448 = vmatprep.subr.bf16.mxu1 %v2799_v59  ;;  %v2862_v56 = vld [vmem:[#allocation5 + $0x3ec] ss:$16 sps:$4 sm:$0xff]   ;;  %v2860_v59 = vld [vmem:[#allocation5 + $0x3e8] ss:$16 sps:$4 sm:$0xff]  }
  0xc0   :  { %1405 = vmatprep.subr.bf16.mxu0 %v2796_v58  ;;  %v2940_v58 = vld [vmem:[#allocation7 + $0x94] ss:$8 sps:$4 sm:$0xff]  }
  0xc2   :  { %1449 = vmatpush1.bf16.msra.mxu1 %v2797_v61  ;;  %v2938_v61 = vld [vmem:[#allocation7 + $0x90] ss:$8 sps:$4 sm:$0xff]  }
  0xc3   :  { %1406 = vmatpush1.bf16.msra.mxu0 %v2794_v60  ;;  %1450 = vmatprep.subr.bf16.mxu1 %v2805_v63  ;;  %v2865_v60 = vld [vmem:[#allocation5 + $0x40c] ss:$16 sps:$4 sm:$0xff]   ;;  %v2863_v63 = vld [vmem:[#allocation5 + $0x408] ss:$16 sps:$4 sm:$0xff]  }
  0xc4   :  { %1407 = vmatprep.subr.bf16.mxu0 %v2802_v62  ;;  %v2943_v62 = vld [vmem:[#allocation7 + $0xa4] ss:$8 sps:$4 sm:$0xff]  }
  0xc6   :  { %1451 = vmatpush1.bf16.msra.mxu1 %v2803_v1  ;;  %v2941_v1 = vld [vmem:[#allocation7 + $0xa0] ss:$8 sps:$4 sm:$0xff]  }
  0xc7   :  { %1408 = vmatpush1.bf16.msra.mxu0 %v2800_v0  ;;  %1452 = vmatprep.subr.bf16.mxu1 %v2811_v3  ;;  %v2868_v0 = vld [vmem:[#allocation5 + $0x42c] ss:$16 sps:$4 sm:$0xff]   ;;  %v2866_v3 = vld [vmem:[#allocation5 + $0x428] ss:$16 sps:$4 sm:$0xff]  }
  0xc8   :  { %1409 = vmatprep.subr.bf16.mxu0 %v2808_v2  ;;  %v2946_v2 = vld [vmem:[#allocation7 + $0xb4] ss:$8 sps:$4 sm:$0xff]  }
  0xca   :  { %1453 = vmatpush1.bf16.msra.mxu1 %v2809_v7  ;;  %v2944_v7 = vld [vmem:[#allocation7 + $0xb0] ss:$8 sps:$4 sm:$0xff]  }
  0xcb   :  { %1410 = vmatpush1.bf16.msra.mxu0 %v2806_v6  ;;  %1465 = vmatprep.subr.bf16.mxu1 %v2817_v8  ;;  %v2871_v6 = vld [vmem:[#allocation5 + $0x44c] ss:$16 sps:$4 sm:$0xff]  }
  0xcc   :  { %1959 = vmatprep.subr.bf16.mxu0 %v2913_v23  ;;  %v2949_v8 = vld [vmem:[#allocation7 + $0xc4] ss:$8 sps:$4 sm:$0xff]   ;;  %v2956_v23 = vld [vmem:[#allocation7 + $0xf0] ss:$8 sps:$4 sm:$0xff]  }
  0xcd   :  { %1455 = vmatmul.mubr.bf16.vlgmr.msra.gmra.mrb[4].mxu1 %v3256_v4  ;;  %v2835_v4 = vld [vmem:[#allocation5 + $0x2cc] ss:$16 sps:$4 sm:$0xff]  }
  0xce   :  { %1412 = vmatmul.mubr.bf16.vlgmr.msra.gmra.mrb[0].mxu0 %v3265_v9  ;;  %1466 = vmatpush1.bf16.msra.mxu1 %v2815_v10  ;;  %v2869_v10 = vld [vmem:[#allocation5 + $0x448] ss:$16 sps:$4 sm:$0xff]  }
  0xcf   :  { %1497 = vmatprep.mubr.bf16.mxu1 %v3253_v51  ;;  %1467 = vmatprep.subr.bf16.mxu1 %v2820_v11  ;;  %v2911_v51 = vld [vmem:[#allocation7] ss:$8 sps:$4 sm:$0xff]   ;;  %v2874_v11 = vld [vmem:[#allocation5 + $0x46c] ss:$16 sps:$4 sm:$0xff]  }
  0xd0   :  { %1960 = vmatpush1.bf16.msra.mxu0 %v2911_v51  ;;  %v2884_v51 = vld [vmem:[#allocation5 + $0x4e8] ss:$16 sps:$4 sm:$0xff]  }
  0xd1   :  { %1961 = vmatprep.subr.bf16.mxu0 %v2916_v24  ;;  %v2889_v24 = vld [vmem:[#allocation5 + $0x50c] ss:$16 sps:$4 sm:$0xff]  }
  0xd2   :  { %1468 = vmatpush1.bf16.msra.mxu1 %v2818_v12  ;;  %v2947_v12 = vld [vmem:[#allocation7 + $0xc0] ss:$8 sps:$4 sm:$0xff]  }
  0xd3   :  { %1469 = vmatprep.subr.bf16.mxu1 %v2823_v13  ;;  %v2952_v13 = vld [vmem:[#allocation7 + $0xd4] ss:$8 sps:$4 sm:$0xff]  }
  0xd4   :  { %1962 = vmatpush1.bf16.msra.mxu0 %v2914_v27  ;;  %v2961_v27 = vld [vmem:[#allocation7 + $0x104] ss:$8 sps:$4 sm:$0xff]  }
  0xd5   :  { %1963 = vmatprep.subr.bf16.mxu0 %v2919_v28  ;;  %v2890_v28 = vld [vmem:[#allocation5 + $0x528] ss:$16 sps:$4 sm:$0xff]  }
  0xd6   :  { %1470 = vmatpush1.bf16.msra.mxu1 %v2821_v14  ;;  %v2877_v14 = vld [vmem:[#allocation5 + $0x48c] ss:$16 sps:$4 sm:$0xff]  }
  0xd7   :  { %1471 = vmatprep.subr.bf16.mxu1 %v2826_v15  ;;  %v2875_v15 = vld [vmem:[#allocation5 + $0x488] ss:$16 sps:$4 sm:$0xff]  }
  0xd8   :  { %1964 = vmatpush1.bf16.msra.mxu0 %v2917_v31  ;;  %v2898_v31 = vld [vmem:[#allocation5 + $0x56c] ss:$16 sps:$4 sm:$0xff]  }
  0xd9   :  { %1965 = vmatprep.subr.bf16.mxu0 %v2922_v33  ;;  %v2901_v33 = vld [vmem:[#allocation5 + $0x58c] ss:$16 sps:$4 sm:$0xff]  }
  0xda   :  { %1472 = vmatpush1.bf16.msra.mxu1 %v2824_v16  ;;  %v2880_v16 = vld [vmem:[#allocation5 + $0x4ac] ss:$16 sps:$4 sm:$0xff]  }
  0xdb   :  { %1473 = vmatprep.subr.bf16.mxu1 %v2829_v17  ;;  %v2878_v17 = vld [vmem:[#allocation5 + $0x4a8] ss:$16 sps:$4 sm:$0xff]  }
  0xdc   :  { %1966 = vmatpush1.bf16.msra.mxu0 %v2920_v36  ;;  %v2904_v36 = vld [vmem:[#allocation5 + $0x5ac] ss:$16 sps:$4 sm:$0xff]  }
  0xdd   :  { %1967 = vmatprep.subr.bf16.mxu0 %v2925_v37  ;;  %v2902_v37 = vld [vmem:[#allocation5 + $0x5a8] ss:$16 sps:$4 sm:$0xff]  }
  0xde   :  { %1474 = vmatpush1.bf16.msra.mxu1 %v2827_v18  ;;  %v2883_v18 = vld [vmem:[#allocation5 + $0x4cc] ss:$16 sps:$4 sm:$0xff]  }
  0xdf   :  { %1475 = vmatprep.subr.bf16.mxu1 %v2832_v19  ;;  %v2955_v19 = vld [vmem:[#allocation7 + $0xe4] ss:$8 sps:$4 sm:$0xff]  }
  0xe0   :  { %1968 = vmatpush1.bf16.msra.mxu0 %v2923_v40  ;;  %v2910_v40 = vld [vmem:[#allocation5 + $0x5ec] ss:$16 sps:$4 sm:$0xff]  }
  0xe1   :  { %1969 = vmatprep.subr.bf16.mxu0 %v2928_v41  ;;  %v2908_v41 = vld [vmem:[#allocation5 + $0x5e8] ss:$16 sps:$4 sm:$0xff]  }
  0xe2   :  { %1476 = vmatpush1.bf16.msra.mxu1 %v2830_v20  ;;  %v2881_v20 = vld [vmem:[#allocation5 + $0x4c8] ss:$16 sps:$4 sm:$0xff]  }
  0xe3   :  { %1477 = vmatprep.subr.bf16.mxu1 %v2835_v4  ;;  %v2953_v4 = vld [vmem:[#allocation7 + $0xe0] ss:$8 sps:$4 sm:$0xff]  }
  0xe4   :  { %1970 = vmatpush1.bf16.msra.mxu0 %v2926_v44 }
  0xe5   :  { %1971 = vmatprep.subr.bf16.mxu0 %v2931_v45 }
  0xe6   :  { %1478 = vmatpush1.bf16.msra.mxu1 %v2833_v21  ;;  %v2886_v21 = vld [vmem:[#allocation5 + $0x4ec] ss:$16 sps:$4 sm:$0xff]  }
  0xe7   :  { %1479 = vmatprep.subr.bf16.mxu1 %v2838_v22  ;;  %v2958_v22 = vld [vmem:[#allocation7 + $0xf4] ss:$8 sps:$4 sm:$0xff]  }
  0xe8   :  { %1972 = vmatpush1.bf16.msra.mxu0 %v2929_v48 }
  0xe9   :  { %1973 = vmatprep.subr.bf16.mxu0 %v2934_v49  ;;  %v3279_v49 = vld [vmem:[%s3319_s2] sm:$0xf] }
  0xea   :  { %1480 = vmatpush1.bf16.msra.mxu1 %v2836_v25  ;;  %v2887_v25 = vld [vmem:[#allocation5 + $0x508] ss:$16 sps:$4 sm:$0xff]  }
  0xeb   :  { %1481 = vmatprep.subr.bf16.mxu1 %v2841_v26  ;;  %v2892_v26 = vld [vmem:[#allocation5 + $0x52c] ss:$16 sps:$4 sm:$0xff]  }
  0xec   :  { %1974 = vmatpush1.bf16.msra.mxu0 %v2932_v53 }
  0xed   :  { %1975 = vmatprep.subr.bf16.mxu0 %v2937_v54 }
  0xee   :  { %1482 = vmatpush1.bf16.msra.mxu1 %v2839_v29  ;;  %v2895_v29 = vld [vmem:[#allocation5 + $0x54c] ss:$16 sps:$4 sm:$0xff]  }
  0xef   :  { %1483 = vmatprep.subr.bf16.mxu1 %v2844_v30  ;;  %v2893_v30 = vld [vmem:[#allocation5 + $0x548] ss:$16 sps:$4 sm:$0xff]  }
  0xf0   :  { %1976 = vmatpush1.bf16.msra.mxu0 %v2935_v57 }
  0xf1   :  { %1977 = vmatprep.subr.bf16.mxu0 %v2940_v58 }
  0xf2   :  { %1484 = vmatpush1.bf16.msra.mxu1 %v2842_v32  ;;  %v2896_v32 = vld [vmem:[#allocation5 + $0x568] ss:$16 sps:$4 sm:$0xff]  }
  0xf3   :  { %1485 = vmatprep.subr.bf16.mxu1 %v2847_v35  ;;  %v2899_v35 = vld [vmem:[#allocation5 + $0x588] ss:$16 sps:$4 sm:$0xff]  }
  0xf4   :  { %1978 = vmatpush1.bf16.msra.mxu0 %v2938_v61 }
  0xf5   :  { %1979 = vmatprep.subr.bf16.mxu0 %v2943_v62 }
  0xf6   :  { %1486 = vmatpush1.bf16.msra.mxu1 %v2845_v38  ;;  %v2907_v38 = vld [vmem:[#allocation5 + $0x5cc] ss:$16 sps:$4 sm:$0xff]  }
  0xf7   :  { %1487 = vmatprep.subr.bf16.mxu1 %v2850_v39  ;;  %v2905_v39 = vld [vmem:[#allocation5 + $0x5c8] ss:$16 sps:$4 sm:$0xff]  }
  0xf8   :  { %1980 = vmatpush1.bf16.msra.mxu0 %v2941_v1 }
  0xf9   :  { %1981 = vmatprep.subr.bf16.mxu0 %v2946_v2 }
  0xfa   :  { %1488 = vmatpush1.bf16.msra.mxu1 %v2848_v42 }
  0xfb   :  { %1489 = vmatprep.subr.bf16.mxu1 %v2853_v43 }
  0xfc   :  { %1982 = vmatpush1.bf16.msra.mxu0 %v2944_v7 }
  0xfd   :  { %1983 = vmatprep.subr.bf16.mxu0 %v2949_v8 }
  0xfe   :  { %1490 = vmatpush1.bf16.msra.mxu1 %v2851_v46  ;;  %v283_v46 = vlaneseq }
  0xff   :  { %1491 = vmatprep.subr.bf16.mxu1 %v2856_v47 }
 0x100   :  { %1984 = vmatpush1.bf16.msra.mxu0 %v2947_v12  ;;  %v3273_v47 = vshrl.u32 %v283_v46, 7  ;;  %v3007_v12 = vld [vmem:[#allocation8 + $0x40] sm:$0xff]  }
 0x101   :  { %1985 = vmatprep.subr.bf16.mxu0 %v2952_v13  ;;  %v3008_v13 = vld [vmem:[#allocation8] sm:$0xff]  }
 0x102   :  { %1492 = vmatpush1.bf16.msra.mxu1 %v2854_v50  ;;  %v285_v48 = vsub.s32 0, %v3273_v47  ;;  %v289_v50 = vsub.s32 1, %v3273_v47  ;;  %v3001_v46 = vld [vmem:[#allocation7 + $0x1e0] ss:$8 sps:$4 sm:$0xff]  }
 0x103   :  { %1493 = vmatprep.subr.bf16.mxu1 %v2859_v52 }
 0x104   :  { %v290_v52 = vrot.slane %v3279_v49, %v289_v50 }
 0x106   :  { %1494 = vmatpush1.bf16.msra.mxu1 %v2857_v55 }
 0x107   :  { %1495 = vmatprep.subr.bf16.mxu1 %v2862_v56 }
 0x10a   :  { %1496 = vmatpush1.bf16.msra.mxu1 %v2860_v59 }
 0x10b   :  { %1508 = vmatprep.subr.bf16.mxu1 %v2865_v60 }
 0x10d   :  { %1498 = vmatmul.mubr.bf16.vlgmr.msra.gmra.mrb[4].mxu1 %v3258_v5  ;;  %v2872_v5 = vld [vmem:[#allocation5 + $0x468] ss:$16 sps:$4 sm:$0xff]  }
 0x10e   :  { %1509 = vmatpush1.bf16.msra.mxu1 %v2863_v63  ;;  %1540 = vmatprep.mubr.bf16.mxu1 %v3262_v34  ;;  %v2950_v34 = vld [vmem:[#allocation7 + $0xd0] ss:$8 sps:$4 sm:$0xff]  }
 0x10f   :  { %1510 = vmatprep.subr.bf16.mxu1 %v2868_v0  ;;  %1986 = vmatpush1.bf16.msra.mxu0 %v2950_v34  ;;  %v2967_v34 = vld [vmem:[#allocation7 + $0x124] ss:$8 sps:$4 sm:$0xff]  }
 0x110   :  { %1987 = vmatprep.subr.bf16.mxu0 %v2955_v19  ;;  %v3012_v19 = vld [vmem:[#allocation8 + $0x10] sm:$0xff]  }
 0x112   :  { %1511 = vmatpush1.bf16.msra.mxu1 %v2866_v3 }
 0x113   :  { %1512 = vmatprep.subr.bf16.mxu1 %v2871_v6  ;;  %1988 = vmatpush1.bf16.msra.mxu0 %v2953_v4  ;;  %v2968_v4 = vld [vmem:[#allocation7 + $0x130] ss:$8 sps:$4 sm:$0xff]  }
 0x114   :  { %1989 = vmatprep.subr.bf16.mxu0 %v2958_v22  ;;  %v3014_v22 = vld [vmem:[#allocation8 + $0x18] sm:$0xff]  }
 0x116   :  { %1513 = vmatpush1.bf16.msra.mxu1 %v2869_v10  ;;  %v2959_v10 = vld [vmem:[#allocation7 + $0x100] ss:$8 sps:$4 sm:$0xff]  }
 0x117   :  { %1514 = vmatprep.subr.bf16.mxu1 %v2874_v11  ;;  %1990 = vmatpush1.bf16.msra.mxu0 %v2956_v23  ;;  %v2964_v11 = vld [vmem:[#allocation7 + $0x114] ss:$8 sps:$4 sm:$0xff]   ;;  %v2971_v23 = vld [vmem:[#allocation7 + $0x140] ss:$8 sps:$4 sm:$0xff]  }
 0x118   :  { %2002 = vmatprep.subr.bf16.mxu0 %v2961_v27  ;;  %v2974_v27 = vld [vmem:[#allocation7 + $0x150] ss:$8 sps:$4 sm:$0xff]  }
 0x11a   :  { %1515 = vmatpush1.bf16.msra.mxu1 %v2872_v5  ;;  %v3009_v5 = vld [vmem:[#allocation8 + $0x48] sm:$0xff]  }
 0x11b   :  { %1516 = vmatprep.subr.bf16.mxu1 %v2877_v14  ;;  %v2962_v14 = vld [vmem:[#allocation7 + $0x110] ss:$8 sps:$4 sm:$0xff]  }
 0x11e   :  { %1517 = vmatpush1.bf16.msra.mxu1 %v2875_v15  ;;  %v3010_v15 = vld [vmem:[#allocation8 + $0x8] sm:$0xff]  }
 0x11f   :  { %1518 = vmatprep.subr.bf16.mxu1 %v2880_v16  ;;  %v3011_v16 = vld [vmem:[#allocation8 + $0x50] sm:$0xff]  }
 0x122   :  { %1519 = vmatpush1.bf16.msra.mxu1 %v2878_v17  ;;  %v2965_v17 = vld [vmem:[#allocation7 + $0x120] ss:$8 sps:$4 sm:$0xff]  }
 0x123   :  { %1520 = vmatprep.subr.bf16.mxu1 %v2883_v18  ;;  %v2970_v18 = vld [vmem:[#allocation7 + $0x134] ss:$8 sps:$4 sm:$0xff]  }
 0x126   :  { %1521 = vmatpush1.bf16.msra.mxu1 %v2881_v20  ;;  %v3013_v20 = vld [vmem:[#allocation8 + $0x58] sm:$0xff]  }
 0x127   :  { %1522 = vmatprep.subr.bf16.mxu1 %v2886_v21  ;;  %v2973_v21 = vld [vmem:[#allocation7 + $0x144] ss:$8 sps:$4 sm:$0xff]  }
 0x12a   :  { %1523 = vmatpush1.bf16.msra.mxu1 %v2884_v51  ;;  %v3015_v51 = vld [vmem:[#allocation8 + $0x60] sm:$0xff]  }
 0x12b   :  { %1524 = vmatprep.subr.bf16.mxu1 %v2889_v24  ;;  %v2976_v24 = vld [vmem:[#allocation7 + $0x154] ss:$8 sps:$4 sm:$0xff]  }
 0x12e   :  { %1525 = vmatpush1.bf16.msra.mxu1 %v2887_v25  ;;  %v3016_v25 = vld [vmem:[#allocation8 + $0x20] sm:$0xff]  }
 0x12f   :  { %1526 = vmatprep.subr.bf16.mxu1 %v2892_v26  ;;  %v3017_v26 = vld [vmem:[#allocation8 + $0x68] sm:$0xff]  }
 0x132   :  { %1527 = vmatpush1.bf16.msra.mxu1 %v2890_v28  ;;  %v2979_v28 = vld [vmem:[#allocation7 + $0x164] ss:$8 sps:$4 sm:$0xff]  }
 0x133   :  { %1528 = vmatprep.subr.bf16.mxu1 %v2895_v29  ;;  %v2977_v29 = vld [vmem:[#allocation7 + $0x160] ss:$8 sps:$4 sm:$0xff]  }
 0x136   :  { %1529 = vmatpush1.bf16.msra.mxu1 %v2893_v30  ;;  %v2982_v30 = vld [vmem:[#allocation7 + $0x174] ss:$8 sps:$4 sm:$0xff]  }
 0x137   :  { %1530 = vmatprep.subr.bf16.mxu1 %v2898_v31  ;;  %v2980_v31 = vld [vmem:[#allocation7 + $0x170] ss:$8 sps:$4 sm:$0xff]  }
 0x13a   :  { %1531 = vmatpush1.bf16.msra.mxu1 %v2896_v32  ;;  %v2985_v32 = vld [vmem:[#allocation7 + $0x184] ss:$8 sps:$4 sm:$0xff]  }
 0x13b   :  { %1532 = vmatprep.subr.bf16.mxu1 %v2901_v33  ;;  %v2983_v33 = vld [vmem:[#allocation7 + $0x180] ss:$8 sps:$4 sm:$0xff]  }
 0x13e   :  { %1533 = vmatpush1.bf16.msra.mxu1 %v2899_v35  ;;  %v2988_v35 = vld [vmem:[#allocation7 + $0x194] ss:$8 sps:$4 sm:$0xff]  }
 0x13f   :  { %1534 = vmatprep.subr.bf16.mxu1 %v2904_v36  ;;  %v2986_v36 = vld [vmem:[#allocation7 + $0x190] ss:$8 sps:$4 sm:$0xff]  }
 0x142   :  { %1535 = vmatpush1.bf16.msra.mxu1 %v2902_v37  ;;  %v2991_v37 = vld [vmem:[#allocation7 + $0x1a4] ss:$8 sps:$4 sm:$0xff]  }
 0x143   :  { %1536 = vmatprep.subr.bf16.mxu1 %v2907_v38  ;;  %v2989_v38 = vld [vmem:[#allocation7 + $0x1a0] ss:$8 sps:$4 sm:$0xff]  }
 0x146   :  { %1537 = vmatpush1.bf16.msra.mxu1 %v2905_v39  ;;  %v2994_v39 = vld [vmem:[#allocation7 + $0x1b4] ss:$8 sps:$4 sm:$0xff]  }
 0x147   :  { %1538 = vmatprep.subr.bf16.mxu1 %v2910_v40  ;;  %v2992_v40 = vld [vmem:[#allocation7 + $0x1b0] ss:$8 sps:$4 sm:$0xff]  }
 0x14a   :  { %1539 = vmatpush1.bf16.msra.mxu1 %v2908_v41  ;;  %v2997_v41 = vld [vmem:[#allocation7 + $0x1c4] ss:$8 sps:$4 sm:$0xff]  }
 0x14b   :  { %2547 = vmatprep.subr.bf16.mxu1 %v3007_v12  ;;  %v3021_v12 = vld [vmem:[#allocation8 + $0x78] sm:$0xff]  }
 0x14d   :  { %1541 = vmatmul.mubr.bf16.vlgmr.msra.gmra.mrb[4].mxu1 %v3265_v9  ;;  %v286_v9 = vrot.slane %v3279_v49, %v285_v48 }
 0x14e   :  { %2548 = vmatpush3.bf16.msra.mxu1 %v3008_v13  ;;  %v3022_v13 = vld [vmem:[#allocation8 + $0x38] sm:$0xff]  }
 0x14f   :  { %2549 = vmatprep.subr.bf16.mxu1 %v3009_v5  ;;  %v1627_v5 = vld [vmem:[%s3321_s4] sm:$0x3] }
 0x152   :  { %2550 = vmatpush3.bf16.msra.mxu1 %v3010_v15 }
 0x153   :  { %2551 = vmatprep.subr.bf16.mxu1 %v3011_v16 }
 0x156   :  { %2552 = vmatpush3.bf16.msra.mxu1 %v3012_v19 }
 0x157   :  { %2553 = vmatprep.subr.bf16.mxu1 %v3013_v20 }
 0x15a   :  { %2554 = vmatpush3.bf16.msra.mxu1 %v3014_v22 }
 0x15b   :  { %2555 = vmatprep.subr.bf16.mxu1 %v3015_v51 }
 0x15e   :  { %2556 = vmatpush3.bf16.msra.mxu1 %v3016_v25 }
 0x15f   :  { %2557 = vmatprep.subr.bf16.mxu1 %v3017_v26 }
 0x160   :  { %v1327_v42 = vpop.f32.mrb[0].mxu1 }
 0x161   :  { %v1329_v43 = vpop.f32.mrb[1].mxu1  ;;  %v1328_v53 = vadd.f32 %v1327_v42, %v286_v9  ;;  %v2995_v42 = vld [vmem:[#allocation7 + $0x1c0] ss:$8 sps:$4 sm:$0xff]  }
 0x162   :  { %v1331_v44 = vpop.f32.mrb[2].mxu1  ;;  %v1330_v54 = vadd.f32 %v1329_v43, %v290_v52  ;;  %v3000_v43 = vld [vmem:[#allocation7 + $0x1d4] ss:$8 sps:$4 sm:$0xff]  }
 0x163   :  { %v1333_v45 = vpop.f32.mrb[3].mxu1  ;;  %v1332_v56 = vadd.f32 %v1331_v44, %v286_v9  ;;  %v2998_v44 = vld [vmem:[#allocation7 + $0x1d0] ss:$8 sps:$4 sm:$0xff]   ;;  %v3006_v9 = vld [vmem:[#allocation7 + $0x1f4] ss:$8 sps:$4 sm:$0xff]  }
 0x164   :  { %v1334_v59 = vadd.f32 %v1333_v45, %v290_v52  ;;  %v3003_v45 = vld [vmem:[#allocation7 + $0x1e4] ss:$8 sps:$4 sm:$0xff]   ;;  %v3004_v52 = vld [vmem:[#allocation7 + $0x1f0] ss:$8 sps:$4 sm:$0xff]  }
 0x1a1   :  { %v1413_v55 = vpop.f32.mrb[0].mxu0 }
 0x1a2   :  { %v2570_v57 = vadd.f32 %v1413_v55, %v1328_v53  ;;  %v1415_v58 = vpop.f32.mrb[1].mxu0  ;;  %v293_v53 = vsub.s32 2, %v3273_v47 }
 0x1a3   :  { %v2572_v60 = vadd.f32 %v1415_v58, %v1330_v54  ;;  %v1417_v61 = vpop.f32.mrb[2].mxu0  ;;  %v297_v54 = vsub.s32 3, %v3273_v47  ;;  %v2530_v47 = vld [vmem:[%s3323_s6] ss:$0 sm:$0xff]  ;;  %s3161_s6 = smov [#allocation10]  }
 0x1a4   :  { %v2574_v62 = vadd.f32 %v1417_v61, %v1332_v56  ;;  %v1419_v63 = vpop.f32.mrb[3].mxu0  ;;  %v1551_v1 = vmax.f32 %v2570_v57, 0.0  ;;  %v294_v55 = vrot.slane %v3279_v49, %v293_v53  ;;  %s2254_s10 = sshll.u32 %s3161_s6, 4  ;;  %s2255_s10 = int_to_ptr.vmem [resolvable:$true] %s2254_s10 }
 0x1a5   :  { %v2576_v0 = vadd.f32 %v1419_v63, %v1334_v59  ;;  %v1552_v3 = vmax.f32 %v2572_v60, 0.0  ;;  %v298_v56 = vrot.slane %v3279_v49, %v297_v54  ;;  %v3020_v49 = vld [vmem:[#allocation8 + $0x30] sm:$0xff]   ;;  %s3119_s11 = scalar_lea.vmem %s2255_s10, 256  ;;  %p3124_p5 = scmp.lt.s32.totalorder %s2255_s10, %s2255_s10 }
 0x1a6   :  { %v1555_v2 = vmax.f32 %v2574_v62, 0.0  ;;  %p3120_p4 = scmp.ne.s32.totalorder %s2255_s10, %s3119_s11  ;;  %p3125_p6 = scmp.lt.s32.totalorder %s3119_s11, %s3119_s11 }
 0x1a7   :  { %v1556_v6 = vmax.f32 %v2576_v0, 0.0 }
 0x1a8   :  { %v1559_v7 = vpack.c.bf16 %v1555_v2, %v1551_v1  ;;  %p3126_p7 = por %p3125_p6, %p3124_p5 }
 0x1a9   :  { %v1560_v8 = vpack.c.bf16 %v1556_v6, %v1552_v3 }
 0x1aa   :  { %p3127_p8 = pnand %p3126_p7, %p3120_p4 }
 0x1ab   :  { %1991 = vmatprep.mubr.bf16.mxu0 %v1560_v8 }
 0x1ac   :  { %1992 = vmatmul.mubr.bf16.vlgmr.msra.gmra.mrb[4].mxu0 %v1559_v7 }
 0x1ad   :  { %2003 = vmatpush1.bf16.msra.mxu0 %v2959_v10  ;;  %v3018_v10 = vld [vmem:[#allocation8 + $0x28] sm:$0xff]  }
 0x1ae   :  { %2004 = vmatprep.subr.bf16.mxu0 %v2964_v11  ;;  %2558 = vmatpush3.bf16.msra.mxu1 %v3018_v10  ;;  %v3019_v11 = vld [vmem:[#allocation8 + $0x70] sm:$0xff]  }
 0x1af   :  { %2559 = vmatprep.subr.bf16.mxu1 %v3019_v11 }
 0x1b1   :  { %2005 = vmatpush1.bf16.msra.mxu0 %v2962_v14  ;;  %v1632_v14 = vrot.slane %v1627_v5, %v285_v48 }
 0x1b2   :  { %2006 = vmatprep.subr.bf16.mxu0 %v2967_v34  ;;  %2560 = vmatpush3.bf16.msra.mxu1 %v3020_v49  ;;  %v1636_v34 = vrot.slane %v1627_v5, %v289_v50 }
 0x1b3   :  { %2561 = vmatprep.subr.bf16.mxu1 %v3021_v12 }
 0x1b5   :  { %2007 = vmatpush1.bf16.msra.mxu0 %v2965_v17 }
 0x1b6   :  { %2008 = vmatprep.subr.bf16.mxu0 %v2970_v18  ;;  %2562 = vmatpush3.bf16.msra.mxu1 %v3022_v13 }
 0x1b9   :  { %2009 = vmatpush1.bf16.msra.mxu0 %v2968_v4 }
 0x1ba   :  { %2010 = vmatprep.subr.bf16.mxu0 %v2973_v21 }
 0x1bd   :  { %2011 = vmatpush1.bf16.msra.mxu0 %v2971_v23 }
 0x1be   :  { %2012 = vmatprep.subr.bf16.mxu0 %v2976_v24 }
 0x1c1   :  { %2013 = vmatpush1.bf16.msra.mxu0 %v2974_v27 }
 0x1c2   :  { %2014 = vmatprep.subr.bf16.mxu0 %v2979_v28 }
 0x1c5   :  { %2015 = vmatpush1.bf16.msra.mxu0 %v2977_v29 }
 0x1c6   :  { %2016 = vmatprep.subr.bf16.mxu0 %v2982_v30 }
 0x1c9   :  { %2017 = vmatpush1.bf16.msra.mxu0 %v2980_v31 }
 0x1ca   :  { %2018 = vmatprep.subr.bf16.mxu0 %v2985_v32 }
 0x1cd   :  { %2019 = vmatpush1.bf16.msra.mxu0 %v2983_v33 }
 0x1ce   :  { %2020 = vmatprep.subr.bf16.mxu0 %v2988_v35 }
 0x1d1   :  { %2021 = vmatpush1.bf16.msra.mxu0 %v2986_v36 }
 0x1d2   :  { %2022 = vmatprep.subr.bf16.mxu0 %v2991_v37 }
 0x1d5   :  { %2023 = vmatpush1.bf16.msra.mxu0 %v2989_v38 }
 0x1d6   :  { %2024 = vmatprep.subr.bf16.mxu0 %v2994_v39 }
 0x1d9   :  { %2025 = vmatpush1.bf16.msra.mxu0 %v2992_v40 }
 0x1da   :  { %2026 = vmatprep.subr.bf16.mxu0 %v2997_v41 }
 0x1dd   :  { %2027 = vmatpush1.bf16.msra.mxu0 %v2995_v42 }
 0x1de   :  { %2028 = vmatprep.subr.bf16.mxu0 %v3000_v43 }
 0x1e1   :  { %2029 = vmatpush1.bf16.msra.mxu0 %v2998_v44 }
 0x1e2   :  { %2030 = vmatprep.subr.bf16.mxu0 %v3003_v45 }
 0x1e5   :  { %2031 = vmatpush1.bf16.msra.mxu0 %v3001_v46 }
 0x1e6   :  { %2032 = vmatprep.subr.bf16.mxu0 %v3006_v9 }
 0x1e9   :  { %2033 = vmatpush1.bf16.msra.mxu0 %v3004_v52 }
 0x220   :  { %v1542_v57 = vpop.f32.mrb[4].mxu1 }
 0x221   :  { %v2577_v58 = vadd.f32 %v1542_v57, %v294_v55  ;;  %v1544_v59 = vpop.f32.mrb[5].mxu1 }
 0x222   :  { %v2578_v60 = vadd.f32 %v1544_v59, %v298_v56  ;;  %v1546_v61 = vpop.f32.mrb[6].mxu1 }
 0x223   :  { %v2579_v62 = vadd.f32 %v1546_v61, %v294_v55  ;;  %v1548_v63 = vpop.f32.mrb[7].mxu1  ;;  %v1553_v1 = vmax.f32 %v2577_v58, 0.0 }
 0x224   :  { %v2580_v0 = vadd.f32 %v1548_v63, %v298_v56  ;;  %v1554_v3 = vmax.f32 %v2578_v60, 0.0 }
 0x225   :  { %v1557_v2 = vmax.f32 %v2579_v62, 0.0 }
 0x226   :  { %v1558_v6 = vmax.f32 %v2580_v0, 0.0 }
 0x227   :  { %v1561_v7 = vpack.c.bf16 %v1557_v2, %v1553_v1 }
 0x228   :  { %v1562_v8 = vpack.c.bf16 %v1558_v6, %v1554_v3 }
 0x22a   :  { %2034 = vmatprep.mubr.bf16.mxu0 %v1562_v8 }
 0x22b   :  { %2035 = vmatmul.mubr.bf16.vlgmr.msra.gmra.mrb[4].mxu0 %v1561_v7 }
 0x2fe   :  { %v2036_v15 = vpop.f32.mrb[4].mxu0 }
 0x2ff   :  { %v2581_v16 = vadd.f32 %v2036_v15, %v1632_v14  ;;  %v2038_v17 = vpop.f32.mrb[5].mxu0 }
 0x300   :  { %v2582_v18 = vadd.f32 %v2038_v17, %v1636_v34  ;;  %v2040_v19 = vpop.f32.mrb[6].mxu0 }
 0x301   :  { %v2583_v20 = vadd.f32 %v2040_v19, %v1632_v14  ;;  %v2042_v4 = vpop.f32.mrb[7].mxu0  ;;  %v2045_v22 = vmax.f32 %v2581_v16, 0.0 }
 0x302   :  { %v2584_v21 = vadd.f32 %v2042_v4, %v1636_v34  ;;  %v2046_v23 = vmax.f32 %v2582_v18, 0.0 }
 0x303   :  { %v2047_v51 = vmax.f32 %v2583_v20, 0.0 }
 0x304   :  { %v2048_v24 = vmax.f32 %v2584_v21, 0.0 }
 0x305   :  { %v2049_v25 = vpack.c.bf16 %v2047_v51, %v2045_v22 }
 0x306   :  { %v2050_v26 = vpack.c.bf16 %v2048_v24, %v2046_v23 }
 0x308   :  { %2218 = vmatprep.mubr.bf16.mxu1 %v2050_v26 }
 0x309   :  { %2219 = vmatmul.mubr.bf16.vlgmr.msra.gmra.mrb[8].mxu1 %v2049_v25 }
 0x3dc   :  { %v2563_v48 = vpop.f32.mrb[8].mxu1 }
 0x3dd   :  { %v2564_v27 = vpop.f32.mrb[9].mxu1 }
 0x3de   :  { %v2565_v50 = vadd.f32 %v2564_v27, %v2563_v48  ;;  %v2566_v28 = vpop.f32.mrb[10].mxu1 }
 0x3df   :  { %v2567_v29 = vpop.f32.mrb[11].mxu1 }
 0x3e0   :  { %v2568_v30 = vadd.f32 %v2567_v29, %v2566_v28  ;;  %v2221_v31 = vadd.f32 %v2565_v50, %v2530_v47 }
 0x3e2   :  { %2227 = vmax.xlane.f32.xlu0 %v2221_v31  ;;  %v2224_v32 = vadd.f32 %v2568_v30, %v2530_v47 }
 0x3e6   :  { %2229 = vmax.xlane.f32.xlu0 %v2224_v32 }
 0x46f   :  { %v2228_v33 = vpop.xlane.xlu0 %2227 }
 0x470   :  { %v2231_v35 = vsub.f32 %v2221_v31, %v2228_v33 }
 0x472   :  { %v2233_v36 = vmul.f32 1.442695, %v2231_v35 }
 0x473   :  { %v2230_v37 = vpop.xlane.xlu0 %2229 }
 0x474   :  { %v2232_v38 = vsub.f32 %v2224_v32, %v2230_v37  ;;  %3023 = vpow2.f32 %v2233_v36 }
 0x476   :  { %v2235_v39 = vmul.f32 1.442695, %v2232_v38 }
 0x478   :  { %3025 = vpow2.f32 %v2235_v39 }
 0x47e   :  { %v3024_v40 = vpop.eup %3023 }
 0x47f   :  { %2237 = vadd.xlane.f32.xlu1 %v3024_v40 }
 0x482   :  { %v3026_v41 = vpop.eup %3025 }
 0x483   :  { %2239 = vadd.xlane.f32.xlu1 %v3026_v41 }
 0x50c   :  { %v2238_v42 = vpop.xlane.xlu1 %2237 }
 0x50d   :  { %3027 = vlog2.f32 %v2238_v42 }
 0x510   :  { %v2240_v43 = vpop.xlane.xlu1 %2239 }
 0x511   :  { %3029 = vlog2.f32 %v2240_v43 }
 0x517   :  { %v3028_v44 = vpop.eup %3027 }
 0x518   :  { %v2242_v45 = vmul.f32 0.6931472, %v3028_v44 }
 0x51a   :  { %v2245_v46 = vsub.f32 %v2231_v35, %v2242_v45 }
 0x51b   :  { %v3030_v9 = vpop.eup %3029 }
 0x51c   :  { %2247 = vst [vmem:[#allocation10] sm:$0xff] %v2245_v46  ;;  %v2244_v52 = vmul.f32 0.6931472, %v3030_v9 }
 0x51e   :  { %v2246_v53 = vsub.f32 %v2232_v38, %v2244_v52 }
 0x520   :  { %2248 = vst [vmem:[#allocation10 + $0x8] sm:$0xff] %v2246_v53 }
 0x521   :  { %3130 = shalt.err (!%p3127_p8)
}
 0x522   :  { %s3131_s14 = scalar_lea.hbm %s3324_s7, 256 }
 0x523   :  { %p3132_p9 = scmp.ne.s32.totalorder %s3324_s7, %s3131_s14  ;;  %p3135_p10 = scmp.lt.u32.totalorder %s3131_s14, %s3324_s7 }
 0x525   :  { %p3137_p11 = pnand %p3135_p10, %p3132_p9 }
 0x527   :  { %3140 = shalt.err (!%p3137_p11)
}
 0x528   :  { %2260 = dma.vmem_to_hbm [thread:$0]  %s2255_s10, 256, %s3324_s7, [#allocation4], %s3156_s0, %s3156_s0, %s3157_s15  }
 0x529   :  { %3147 = dma.done.wait [#allocation4], 256  }
 0x52a   :  { %3148 = vsyncadd [#allocation4], 4294967040 }
 0x52b   :  { %2264 = vsyncpa [#allocation3], 1 }
 0x52c   :  { %2265 = vsyncpa [#allocation6], 1 }
 0x52d   :  { %2266 = vsyncpa [#allocation9], 1 }
 0x52e   :  { %2267 = vsyncpa [#allocation4], 1 }

</bundles_post_ra>
